<compile_context>
chip_gen: v7x
topology: tpu7x:2x2x1
jax: 0.10.0
libtpu: 0.0.40
codegen_flags: <defaults>
</compile_context>

<pallas_src>
import functools

import jax
import jax.numpy as jnp
from jax import lax
from jax.experimental import pallas as pl
from jax.experimental.pallas import tpu as pltpu

D_MODEL = 32
N_HEADS = 4
D_FF = 64
HEAD_DIM = D_MODEL // N_HEADS
EPS = 1e-5  # torch LayerNorm default

# 128-aligned column offsets of the packed weight slab wA (see pack_params):
#   [0:96)    w_in_s   (QKV in-proj, self-attn)
#   [128:160) w_o_s    (out-proj, self-attn)
#   [256:352) w_in_c   (QKV in-proj, cross-attn)
#   [384:416) w_o_c    (out-proj, cross-attn)
#   [512:576) w1       (FFN up-proj)
_WA_COLS = 640


# ---------------- in-kernel math helpers -----------------------------------------

def _layernorm(x, gamma, beta):
    mu = jnp.mean(x, axis=-1, keepdims=True)
    xc = x - mu
    var = jnp.mean(xc * xc, axis=-1, keepdims=True)
    return xc * lax.rsqrt(var + EPS) * gamma + beta


def _softmax(x):
    m = jnp.max(x, axis=-1, keepdims=True)
    e = jnp.exp(x - m)
    return e * pl.reciprocal(jnp.sum(e, axis=-1, keepdims=True), approx=True)


def _gemm(x, w, b=None):
    """bf16 MXU operands (w already bf16), f32 accumulation."""
    y = jnp.dot(x.astype(jnp.bfloat16), w, preferred_element_type=jnp.float32)
    if b is not None:
        y = y + b
    return y


def _attn(q, k, v, w_out, b_out, t_q, t_kv):
    """Head-batched attention for one example.

    q: (t_q, D), k/v: (t_kv, D); 1/sqrt(head_dim) already folded into q.
    One scores einsum + one softmax + one p@v einsum + one out-proj GEMM.
    """
    qh = q.astype(jnp.bfloat16).reshape(t_q, N_HEADS, HEAD_DIM)
    kh = k.astype(jnp.bfloat16).reshape(t_kv, N_HEADS, HEAD_DIM)
    vh = v.astype(jnp.bfloat16).reshape(t_kv, N_HEADS, HEAD_DIM)
    s = jnp.einsum('qhd,khd->hqk', qh, kh,
                   preferred_element_type=jnp.float32)        # (H, t_q, t_kv)
    p = _softmax(s)                                            # f32 softmax
    ctx = jnp.einsum('hqk,khd->qhd', p.astype(jnp.bfloat16), vh,
                     preferred_element_type=jnp.float32)      # (t_q, H, hd)
    ctx = ctx.reshape(t_q, D_MODEL)
    return _gemm(ctx, w_out) + b_out


# ---------------- Pallas kernel: one decoder layer for one batch element ----------

def decoder_layer_kernel(x_ref, mem_ref, wA_ref, w2_ref, vec_ref, out_ref,
                         *, t_tgt, t_mem):
    d, dff = D_MODEL, D_FF

    x = x_ref[...]        # (T, D)   f32
    mem = mem_ref[...]    # (M, D)   f32
    wA = wA_ref[...]      # (D, 640) bf16  packed, 128-aligned segments
    w2 = w2_ref[...]      # (D_FF, D) bf16
    vec = vec_ref[...]    # (12, 128) f32  one bias / LN vector per row

    # static slices of the packed slabs (all segment starts 128-lane aligned)
    w_in_s = wA[:, 0:3 * d]
    w_o_s = wA[:, 128:128 + d]
    w_in_c = wA[:, 256:256 + 3 * d]
    w_o_c = wA[:, 384:384 + d]
    w1 = wA[:, 512:512 + dff]

    b_in_s = vec[0:1, 0:3 * d]
    b_o_s = vec[1:2, 0:d]
    b_in_c = vec[2:3, 0:3 * d]
    b_o_c = vec[3:4, 0:d]
    b1 = vec[4:5, 0:dff]
    b2 = vec[5:6, 0:d]
    g1, be1 = vec[6:7, 0:d], vec[7:8, 0:d]
    g2, be2 = vec[8:9, 0:d], vec[9:10, 0:d]
    g3, be3 = vec[10:11, 0:d], vec[11:12, 0:d]

    # ---- self-attention, post-norm: x = norm1(x + SA(x)) ----
    qkv = _gemm(x, w_in_s, b_in_s)                      # fused QKV: (T, 3D)
    sa = _attn(qkv[:, 0:d], qkv[:, d:2 * d], qkv[:, 2 * d:3 * d],
               w_o_s, b_o_s, t_tgt, t_tgt)
    x = _layernorm(x + sa, g1, be1)

    # ---- cross-attention, post-norm: x = norm2(x + CA(x, mem)) ----
    q_c = _gemm(x, w_in_c[:, 0:d], b_in_c[:, 0:d])              # (T, D)
    kv_c = _gemm(mem, w_in_c[:, d:3 * d], b_in_c[:, d:3 * d])   # fused KV: (M, 2D)
    ca = _attn(q_c, kv_c[:, 0:d], kv_c[:, d:2 * d],
               w_o_c, b_o_c, t_tgt, t_mem)
    x = _layernorm(x + ca, g2, be2)

    # ---- feed-forward, post-norm: x = norm3(x + W2 relu(W1 x + b1) + b2) ----
    h = jnp.maximum(_gemm(x, w1, b1), 0.0)
    ff = _gemm(h, w2, b2)
    x = _layernorm(x + ff, g3, be3)

    out_ref[...] = x


def transformer_decoder_layer(tgt, memory, kparams):
    B, T, D = tgt.shape
    _, M, _ = memory.shape
    wA, w2, vec = kparams["wA"], kparams["w2"], kparams["vec"]
    kernel = functools.partial(decoder_layer_kernel, t_tgt=T, t_mem=M)
    out = pl.pallas_call(
        kernel,
        out_shape=jax.ShapeDtypeStruct((B, T, D), jnp.float32),
        grid=(B,),
        in_specs=[
            pl.BlockSpec((None, T, D), lambda b: (b, 0, 0)),     # tgt, per batch
            pl.BlockSpec((None, M, D), lambda b: (b, 0, 0)),     # memory, per batch
            pl.BlockSpec(wA.shape, lambda b: (0, 0)),            # weights: resident
            pl.BlockSpec(w2.shape, lambda b: (0, 0)),
            pl.BlockSpec(vec.shape, lambda b: (0, 0)),
        ],
        out_specs=pl.BlockSpec((None, T, D), lambda b: (b, 0, 0)),
        compiler_params=pltpu.CompilerParams(
            dimension_semantics=("parallel",)),
    )(tgt, memory, wA, w2, vec)
    return out


# ---------------- parameter packing (static weight transforms) --------------------

def pack_params(p):
    """Pack 18 arrays into 3 slabs.

    * 1/sqrt(head_dim) folded into the Q columns/bias of both in-projections.
    * Weight slab (wA) and FFN down-proj (w2) stored in bf16; each wA segment
      zero-padded to a multiple of 128 columns so every slice start is lane-aligned.
    * Bias / LayerNorm vectors packed one per row into a (12, 128) f32 slab.
    """
    d = D_MODEL
    scale = 1.0 / (HEAD_DIM ** 0.5)
    w_in_s = p["w_in_s"].at[:, 0:d].multiply(scale)
    b_in_s = p["b_in_s"].at[:, 0:d].multiply(scale)
    w_in_c = p["w_in_c"].at[:, 0:d].multiply(scale)
    b_in_c = p["b_in_c"].at[:, 0:d].multiply(scale)

    def pad128(w):
        pad = (-w.shape[1]) % 128
        return jnp.pad(w, ((0, 0), (0, pad)))

    wA = jnp.concatenate(
        [pad128(w_in_s), pad128(p["w_o_s"]), pad128(w_in_c),
         pad128(p["w_o_c"]), pad128(p["w1"])], axis=1).astype(jnp.bfloat16)
    assert wA.shape == (d, _WA_COLS)

    def row(v):
        return jnp.pad(v, ((0, 0), (0, 128 - v.shape[1])))

    vec = jnp.concatenate(
        [row(b_in_s), row(p["b_o_s"]), row(b_in_c), row(p["b_o_c"]),
         row(p["b1"]), row(p["b2"]),
         row(p["g1"]), row(p["be1"]), row(p["g2"]), row(p["be2"]),
         row(p["g3"]), row(p["be3"])], axis=0)                  # (12, 128) f32

    return {"wA": wA, "w2": p["w2"].astype(jnp.bfloat16), "vec": vec}


# ---------------- pure-JAX f32 reference (natural-layout params) ------------------

def reference(tgt, memory, p):
    d, hd = D_MODEL, HEAD_DIM
    scale = 1.0 / (hd ** 0.5)

    def softmax(x):
        m = jnp.max(x, axis=-1, keepdims=True)
        e = jnp.exp(x - m)
        return e / jnp.sum(e, axis=-1, keepdims=True)

    def layernorm(x, g, b):
        mu = jnp.mean(x, -1, keepdims=True)
        var = jnp.mean((x - mu) ** 2, -1, keepdims=True)
        return (x - mu) * lax.rsqrt(var + EPS) * g + b

    def mha(q_in, kv_in, w_in, b_in, w_out, b_out):
        q = q_in @ w_in[:, 0:d] + b_in[0, 0:d]
        k = kv_in @ w_in[:, d:2 * d] + b_in[0, d:2 * d]
        v = kv_in @ w_in[:, 2 * d:3 * d] + b_in[0, 2 * d:3 * d]
        outs = []
        for h in range(N_HEADS):
            sl = slice(h * hd, (h + 1) * hd)
            s = (q[:, sl] @ k[:, sl].T) * scale
            outs.append(softmax(s) @ v[:, sl])
        return jnp.concatenate(outs, -1) @ w_out + b_out[0]

    def one(x, mem):
        x = layernorm(x + mha(x, x, p["w_in_s"], p["b_in_s"], p["w_o_s"], p["b_o_s"]),
                      p["g1"][0], p["be1"][0])
        x = layernorm(x + mha(x, mem, p["w_in_c"], p["b_in_c"], p["w_o_c"], p["b_o_c"]),
                      p["g2"][0], p["be2"][0])
        h = jnp.maximum(x @ p["w1"] + p["b1"][0], 0.0)
        return layernorm(x + h @ p["w2"] + p["b2"][0], p["g3"][0], p["be3"][0])

    return jax.vmap(one)(tgt, memory)


# ---------------- deterministic parameter init ------------------------------------

def init_params(key, d_model, d_ff):
    ks = jax.random.split(key, 12)
    s = 0.1
    return {
        # in-proj weights stored as (D, 3D): pre-transposed relative to torch's
        # in_proj_weight of shape (3D, D) so the kernel does x @ W.
        "w_in_s": jax.random.normal(ks[0], (d_model, 3 * d_model), jnp.float32) * s,
        "b_in_s": jax.random.normal(ks[1], (1, 3 * d_model), jnp.float32) * s,
        "w_o_s":  jax.random.normal(ks[2], (d_model, d_model), jnp.float32) * s,
        "b_o_s":  jax.random.normal(ks[3], (1, d_model), jnp.float32) * s,
        "w_in_c": jax.random.normal(ks[4], (d_model, 3 * d_model), jnp.float32) * s,
        "b_in_c": jax.random.normal(ks[5], (1, 3 * d_model), jnp.float32) * s,
        "w_o_c":  jax.random.normal(ks[6], (d_model, d_model), jnp.float32) * s,
        "b_o_c":  jax.random.normal(ks[7], (1, d_model), jnp.float32) * s,
        "w1":     jax.random.normal(ks[8], (d_model, d_ff), jnp.float32) * s,
        "b1":     jax.random.normal(ks[9], (1, d_ff), jnp.float32) * s,
        "w2":     jax.random.normal(ks[10], (d_ff, d_model), jnp.float32) * s,
        "b2":     jax.random.normal(ks[11], (1, d_model), jnp.float32) * s,
        "g1": jnp.ones((1, d_model), jnp.float32),
        "be1": jnp.zeros((1, d_model), jnp.float32),
        "g2": jnp.ones((1, d_model), jnp.float32),
        "be2": jnp.zeros((1, d_model), jnp.float32),
        "g3": jnp.ones((1, d_model), jnp.float32),
        "be3": jnp.zeros((1, d_model), jnp.float32),
    }


if __name__ == "__main__":
    key = jax.random.PRNGKey(0)
    k_tgt, k_mem, k_par = jax.random.split(key, 3)

    B, T, M = 2, 8, 8
    tgt = jax.random.normal(k_tgt, (B, T, D_MODEL), jnp.float32)
    memory = jax.random.normal(k_mem, (B, M, D_MODEL), jnp.float32)
    params = init_params(k_par, D_MODEL, D_FF)
    kparams = pack_params(params)

    out = jax.block_until_ready(transformer_decoder_layer(tgt, memory, kparams))
    ref = jax.block_until_ready(reference(tgt, memory, params))

    assert out.shape == (B, T, D_MODEL)
    # Kernel uses bf16 matmul operands (f32 accumulation) and an approx softmax
    # reciprocal; reference is pure f32, so tolerance reflects bf16 rounding
    # across ~6 chained GEMMs on O(1) data.
    err = jnp.max(jnp.abs(out - ref))
    assert jnp.allclose(out, ref, atol=5e-2, rtol=5e-2), \
        f"mismatch vs reference, max abs err {err}"

    print("KERNEL_OK")
</pallas_src>

<mosaic_0001>
module attributes {stable_mosaic.version = 11 : i64} {
  func.func @decoder_layer_kernel(%arg0: i32, %arg1: memref<1x8x32xf32, #tpu.memory_space<vmem>>, %arg2: memref<1x8x32xf32, #tpu.memory_space<vmem>>, %arg3: memref<32x640xbf16, #tpu.memory_space<vmem>>, %arg4: memref<64x32xbf16, #tpu.memory_space<vmem>>, %arg5: memref<12x128xf32, #tpu.memory_space<vmem>>, %arg6: memref<1x8x32xf32, #tpu.memory_space<vmem>>) attributes {dimension_semantics = [#tpu.dimension_semantics<parallel>], iteration_bounds = array<i64: 2>, scalar_prefetch = 0 : i64, scratch_operands = 0 : i64, tpu.core_type = #tpu.core_type<tc>, window_params = [{transform_indices = @transform_0, window_bounds = array<i64: 1, 8, 32>}, {transform_indices = @transform_1, window_bounds = array<i64: 1, 8, 32>}, {pipeline_mode = #tpu.pipeline_mode<synchronous>, transform_indices = @transform_2, window_bounds = array<i64: 32, 640>}, {pipeline_mode = #tpu.pipeline_mode<synchronous>, transform_indices = @transform_3, window_bounds = array<i64: 64, 32>}, {pipeline_mode = #tpu.pipeline_mode<synchronous>, transform_indices = @transform_4, window_bounds = array<i64: 12, 128>}, {transform_indices = @transform_5, window_bounds = array<i64: 1, 8, 32>}]} {
    %c0 = arith.constant 0 : index
    %c0_0 = arith.constant 0 : index
    %c0_1 = arith.constant 0 : index
    %0 = vector.load %arg1[%c0, %c0_0, %c0_1] : memref<1x8x32xf32, #tpu.memory_space<vmem>>, vector<1x8x32xf32>
    %1 = vector.shape_cast %0 : vector<1x8x32xf32> to vector<8x32xf32>
    %c0_2 = arith.constant 0 : index
    %c0_3 = arith.constant 0 : index
    %c0_4 = arith.constant 0 : index
    %2 = vector.load %arg2[%c0_2, %c0_3, %c0_4] : memref<1x8x32xf32, #tpu.memory_space<vmem>>, vector<1x8x32xf32>
    %3 = vector.shape_cast %2 : vector<1x8x32xf32> to vector<8x32xf32>
    %c0_5 = arith.constant 0 : index
    %c0_6 = arith.constant 0 : index
    %4 = vector.load %arg3[%c0_5, %c0_6] : memref<32x640xbf16, #tpu.memory_space<vmem>>, vector<32x640xbf16>
    %c0_7 = arith.constant 0 : index
    %c0_8 = arith.constant 0 : index
    %5 = vector.load %arg4[%c0_7, %c0_8] : memref<64x32xbf16, #tpu.memory_space<vmem>>, vector<64x32xbf16>
    %c0_9 = arith.constant 0 : index
    %c0_10 = arith.constant 0 : index
    %6 = vector.load %arg5[%c0_9, %c0_10] : memref<12x128xf32, #tpu.memory_space<vmem>>, vector<12x128xf32>
    %7 = vector.extract_strided_slice %4 {offsets = [0, 0], sizes = [32, 96], strides = [1, 1]} : vector<32x640xbf16> to vector<32x96xbf16>
    %8 = vector.extract_strided_slice %4 {offsets = [0, 128], sizes = [32, 32], strides = [1, 1]} : vector<32x640xbf16> to vector<32x32xbf16>
    %9 = vector.extract_strided_slice %4 {offsets = [0, 256], sizes = [32, 96], strides = [1, 1]} : vector<32x640xbf16> to vector<32x96xbf16>
    %10 = vector.extract_strided_slice %4 {offsets = [0, 384], sizes = [32, 32], strides = [1, 1]} : vector<32x640xbf16> to vector<32x32xbf16>
    %11 = vector.extract_strided_slice %4 {offsets = [0, 512], sizes = [32, 64], strides = [1, 1]} : vector<32x640xbf16> to vector<32x64xbf16>
    %12 = vector.extract_strided_slice %6 {offsets = [0, 0], sizes = [1, 96], strides = [1, 1]} : vector<12x128xf32> to vector<1x96xf32>
    %13 = vector.extract_strided_slice %6 {offsets = [1, 0], sizes = [1, 32], strides = [1, 1]} : vector<12x128xf32> to vector<1x32xf32>
    %14 = vector.extract_strided_slice %6 {offsets = [2, 0], sizes = [1, 96], strides = [1, 1]} : vector<12x128xf32> to vector<1x96xf32>
    %15 = vector.extract_strided_slice %6 {offsets = [3, 0], sizes = [1, 32], strides = [1, 1]} : vector<12x128xf32> to vector<1x32xf32>
    %16 = vector.extract_strided_slice %6 {offsets = [4, 0], sizes = [1, 64], strides = [1, 1]} : vector<12x128xf32> to vector<1x64xf32>
    %17 = vector.extract_strided_slice %6 {offsets = [5, 0], sizes = [1, 32], strides = [1, 1]} : vector<12x128xf32> to vector<1x32xf32>
    %18 = vector.extract_strided_slice %6 {offsets = [6, 0], sizes = [1, 32], strides = [1, 1]} : vector<12x128xf32> to vector<1x32xf32>
    %19 = vector.extract_strided_slice %6 {offsets = [7, 0], sizes = [1, 32], strides = [1, 1]} : vector<12x128xf32> to vector<1x32xf32>
    %20 = vector.extract_strided_slice %6 {offsets = [8, 0], sizes = [1, 32], strides = [1, 1]} : vector<12x128xf32> to vector<1x32xf32>
    %21 = vector.extract_strided_slice %6 {offsets = [9, 0], sizes = [1, 32], strides = [1, 1]} : vector<12x128xf32> to vector<1x32xf32>
    %22 = vector.extract_strided_slice %6 {offsets = [10, 0], sizes = [1, 32], strides = [1, 1]} : vector<12x128xf32> to vector<1x32xf32>
    %23 = vector.extract_strided_slice %6 {offsets = [11, 0], sizes = [1, 32], strides = [1, 1]} : vector<12x128xf32> to vector<1x32xf32>
    %24 = arith.truncf %1 : vector<8x32xf32> to vector<8x32xbf16>
    %cst = arith.constant dense<0.000000e+00> : vector<8x96xf32>
    %25 = tpu.matmul %24, %7, %cst {dimension_numbers = #tpu.dot_dimension_numbers<[1], [0], [0], [1], [0, 0, 1, 1], [], []>} : vector<8x32xbf16>, vector<32x96xbf16>, vector<8x96xf32> -> vector<8x96xf32>
    %26 = vector.broadcast %12 : vector<1x96xf32> to vector<8x96xf32>
    %27 = arith.addf %25, %26 : vector<8x96xf32>
    %28 = vector.extract_strided_slice %27 {offsets = [0, 0], sizes = [8, 32], strides = [1, 1]} : vector<8x96xf32> to vector<8x32xf32>
    %29 = vector.extract_strided_slice %27 {offsets = [0, 32], sizes = [8, 32], strides = [1, 1]} : vector<8x96xf32> to vector<8x32xf32>
    %30 = vector.extract_strided_slice %27 {offsets = [0, 64], sizes = [8, 32], strides = [1, 1]} : vector<8x96xf32> to vector<8x32xf32>
    %31 = arith.truncf %28 : vector<8x32xf32> to vector<8x32xbf16>
    %32 = vector.shape_cast %31 : vector<8x32xbf16> to vector<8x4x8xbf16>
    %33 = arith.truncf %29 : vector<8x32xf32> to vector<8x32xbf16>
    %34 = vector.shape_cast %33 : vector<8x32xbf16> to vector<8x4x8xbf16>
    %35 = arith.truncf %30 : vector<8x32xf32> to vector<8x32xbf16>
    %36 = vector.shape_cast %35 : vector<8x32xbf16> to vector<8x4x8xbf16>
    "tpu.trace_start"() <{level = 10 : i32, message = "qhd,khd->hqk"}> : () -> ()
    %cst_11 = arith.constant dense<0.000000e+00> : vector<4x8x8xf32>
    %37 = tpu.matmul %32, %34, %cst_11 {dimension_numbers = #tpu.dot_dimension_numbers<[2], [2], [0], [0], [0, 1, 0, 0, 1, 0], [1], [1]>} : vector<8x4x8xbf16>, vector<8x4x8xbf16>, vector<4x8x8xf32> -> vector<4x8x8xf32>
    "tpu.trace_stop"() : () -> ()
    %cst_12 = arith.constant dense<0xFF800000> : vector<4x8xf32>
    %38 = vector.multi_reduction <maximumf>, %37, %cst_12 [2] : vector<4x8x8xf32> to vector<4x8xf32>
    %39 = vector.shape_cast %38 : vector<4x8xf32> to vector<4x8x1xf32>
    %40 = vector.broadcast %39 : vector<4x8x1xf32> to vector<4x8x8xf32>
    %41 = arith.subf %37, %40 : vector<4x8x8xf32>
    %42 = math.exp %41 : vector<4x8x8xf32>
    %cst_13 = arith.constant dense<0.000000e+00> : vector<4x8xf32>
    %43 = vector.multi_reduction <add>, %42, %cst_13 [2] : vector<4x8x8xf32> to vector<4x8xf32>
    %44 = vector.shape_cast %43 : vector<4x8xf32> to vector<4x8x1xf32>
    %45 = tpu.reciprocal %44 {approx = true} : vector<4x8x1xf32> -> vector<4x8x1xf32>
    %46 = vector.broadcast %45 : vector<4x8x1xf32> to vector<4x8x8xf32>
    %47 = arith.mulf %42, %46 : vector<4x8x8xf32>
    %48 = arith.truncf %47 : vector<4x8x8xf32> to vector<4x8x8xbf16>
    "tpu.trace_start"() <{level = 10 : i32, message = "hqk,khd->qhd"}> : () -> ()
    %cst_14 = arith.constant dense<0.000000e+00> : vector<4x8x8xf32>
    %49 = tpu.matmul %36, %48, %cst_14 {dimension_numbers = #tpu.dot_dimension_numbers<[0], [2], [2], [1], [0, 1, 0, 2, 1, 1], [1], [0]>} : vector<8x4x8xbf16>, vector<4x8x8xbf16>, vector<4x8x8xf32> -> vector<4x8x8xf32>
    %50 = tpu.transpose %49, [2, 0, 1] : vector<4x8x8xf32> -> vector<8x4x8xf32>
    "tpu.trace_stop"() : () -> ()
    %51 = vector.shape_cast %50 : vector<8x4x8xf32> to vector<8x32xf32>
    %52 = arith.truncf %51 : vector<8x32xf32> to vector<8x32xbf16>
    %cst_15 = arith.constant dense<0.000000e+00> : vector<8x32xf32>
    %53 = tpu.matmul %52, %8, %cst_15 {dimension_numbers = #tpu.dot_dimension_numbers<[1], [0], [0], [1], [0, 0, 1, 1], [], []>} : vector<8x32xbf16>, vector<32x32xbf16>, vector<8x32xf32> -> vector<8x32xf32>
    %54 = vector.broadcast %13 : vector<1x32xf32> to vector<8x32xf32>
    %55 = arith.addf %53, %54 : vector<8x32xf32>
    %56 = arith.addf %1, %55 : vector<8x32xf32>
    %cst_16 = arith.constant dense<0.000000e+00> : vector<8xf32>
    %57 = vector.multi_reduction <add>, %56, %cst_16 [1] : vector<8x32xf32> to vector<8xf32>
    %58 = vector.shape_cast %57 : vector<8xf32> to vector<8x1xf32>
    %cst_17 = arith.constant 3.200000e+01 : f32
    %59 = vector.broadcast %cst_17 : f32 to vector<8x1xf32>
    %60 = arith.divf %58, %59 : vector<8x1xf32>
    %61 = vector.broadcast %60 : vector<8x1xf32> to vector<8x32xf32>
    %62 = arith.subf %56, %61 : vector<8x32xf32>
    %63 = arith.mulf %62, %62 : vector<8x32xf32>
    %cst_18 = arith.constant dense<0.000000e+00> : vector<8xf32>
    %64 = vector.multi_reduction <add>, %63, %cst_18 [1] : vector<8x32xf32> to vector<8xf32>
    %65 = vector.shape_cast %64 : vector<8xf32> to vector<8x1xf32>
    %cst_19 = arith.constant 3.200000e+01 : f32
    %66 = vector.broadcast %cst_19 : f32 to vector<8x1xf32>
    %67 = arith.divf %65, %66 : vector<8x1xf32>
    %cst_20 = arith.constant 9.99999974E-6 : f32
    %68 = vector.broadcast %cst_20 : f32 to vector<8x1xf32>
    %69 = arith.addf %67, %68 : vector<8x1xf32>
    %70 = math.rsqrt %69 : vector<8x1xf32>
    %71 = vector.broadcast %70 : vector<8x1xf32> to vector<8x32xf32>
    %72 = arith.mulf %62, %71 : vector<8x32xf32>
    %73 = vector.broadcast %18 : vector<1x32xf32> to vector<8x32xf32>
    %74 = arith.mulf %72, %73 : vector<8x32xf32>
    %75 = vector.broadcast %19 : vector<1x32xf32> to vector<8x32xf32>
    %76 = arith.addf %74, %75 : vector<8x32xf32>
    %77 = vector.extract_strided_slice %9 {offsets = [0, 0], sizes = [32, 32], strides = [1, 1]} : vector<32x96xbf16> to vector<32x32xbf16>
    %78 = vector.extract_strided_slice %14 {offsets = [0, 0], sizes = [1, 32], strides = [1, 1]} : vector<1x96xf32> to vector<1x32xf32>
    %79 = arith.truncf %76 : vector<8x32xf32> to vector<8x32xbf16>
    %cst_21 = arith.constant dense<0.000000e+00> : vector<8x32xf32>
    %80 = tpu.matmul %79, %77, %cst_21 {dimension_numbers = #tpu.dot_dimension_numbers<[1], [0], [0], [1], [0, 0, 1, 1], [], []>} : vector<8x32xbf16>, vector<32x32xbf16>, vector<8x32xf32> -> vector<8x32xf32>
    %81 = vector.broadcast %78 : vector<1x32xf32> to vector<8x32xf32>
    %82 = arith.addf %80, %81 : vector<8x32xf32>
    %83 = vector.extract_strided_slice %9 {offsets = [0, 32], sizes = [32, 64], strides = [1, 1]} : vector<32x96xbf16> to vector<32x64xbf16>
    %84 = vector.extract_strided_slice %14 {offsets = [0, 32], sizes = [1, 64], strides = [1, 1]} : vector<1x96xf32> to vector<1x64xf32>
    %85 = arith.truncf %3 : vector<8x32xf32> to vector<8x32xbf16>
    %cst_22 = arith.constant dense<0.000000e+00> : vector<8x64xf32>
    %86 = tpu.matmul %85, %83, %cst_22 {dimension_numbers = #tpu.dot_dimension_numbers<[1], [0], [0], [1], [0, 0, 1, 1], [], []>} : vector<8x32xbf16>, vector<32x64xbf16>, vector<8x64xf32> -> vector<8x64xf32>
    %87 = vector.broadcast %84 : vector<1x64xf32> to vector<8x64xf32>
    %88 = arith.addf %86, %87 : vector<8x64xf32>
    %89 = vector.extract_strided_slice %88 {offsets = [0, 0], sizes = [8, 32], strides = [1, 1]} : vector<8x64xf32> to vector<8x32xf32>
    %90 = vector.extract_strided_slice %88 {offsets = [0, 32], sizes = [8, 32], strides = [1, 1]} : vector<8x64xf32> to vector<8x32xf32>
    %91 = arith.truncf %82 : vector<8x32xf32> to vector<8x32xbf16>
    %92 = vector.shape_cast %91 : vector<8x32xbf16> to vector<8x4x8xbf16>
    %93 = arith.truncf %89 : vector<8x32xf32> to vector<8x32xbf16>
    %94 = vector.shape_cast %93 : vector<8x32xbf16> to vector<8x4x8xbf16>
    %95 = arith.truncf %90 : vector<8x32xf32> to vector<8x32xbf16>
    %96 = vector.shape_cast %95 : vector<8x32xbf16> to vector<8x4x8xbf16>
    "tpu.trace_start"() <{level = 10 : i32, message = "qhd,khd->hqk"}> : () -> ()
    %cst_23 = arith.constant dense<0.000000e+00> : vector<4x8x8xf32>
    %97 = tpu.matmul %92, %94, %cst_23 {dimension_numbers = #tpu.dot_dimension_numbers<[2], [2], [0], [0], [0, 1, 0, 0, 1, 0], [1], [1]>} : vector<8x4x8xbf16>, vector<8x4x8xbf16>, vector<4x8x8xf32> -> vector<4x8x8xf32>
    "tpu.trace_stop"() : () -> ()
    %cst_24 = arith.constant dense<0xFF800000> : vector<4x8xf32>
    %98 = vector.multi_reduction <maximumf>, %97, %cst_24 [2] : vector<4x8x8xf32> to vector<4x8xf32>
    %99 = vector.shape_cast %98 : vector<4x8xf32> to vector<4x8x1xf32>
    %100 = vector.broadcast %99 : vector<4x8x1xf32> to vector<4x8x8xf32>
    %101 = arith.subf %97, %100 : vector<4x8x8xf32>
    %102 = math.exp %101 : vector<4x8x8xf32>
    %cst_25 = arith.constant dense<0.000000e+00> : vector<4x8xf32>
    %103 = vector.multi_reduction <add>, %102, %cst_25 [2] : vector<4x8x8xf32> to vector<4x8xf32>
    %104 = vector.shape_cast %103 : vector<4x8xf32> to vector<4x8x1xf32>
    %105 = tpu.reciprocal %104 {approx = true} : vector<4x8x1xf32> -> vector<4x8x1xf32>
    %106 = vector.broadcast %105 : vector<4x8x1xf32> to vector<4x8x8xf32>
    %107 = arith.mulf %102, %106 : vector<4x8x8xf32>
    %108 = arith.truncf %107 : vector<4x8x8xf32> to vector<4x8x8xbf16>
    "tpu.trace_start"() <{level = 10 : i32, message = "hqk,khd->qhd"}> : () -> ()
    %cst_26 = arith.constant dense<0.000000e+00> : vector<4x8x8xf32>
    %109 = tpu.matmul %96, %108, %cst_26 {dimension_numbers = #tpu.dot_dimension_numbers<[0], [2], [2], [1], [0, 1, 0, 2, 1, 1], [1], [0]>} : vector<8x4x8xbf16>, vector<4x8x8xbf16>, vector<4x8x8xf32> -> vector<4x8x8xf32>
    %110 = tpu.transpose %109, [2, 0, 1] : vector<4x8x8xf32> -> vector<8x4x8xf32>
    "tpu.trace_stop"() : () -> ()
    %111 = vector.shape_cast %110 : vector<8x4x8xf32> to vector<8x32xf32>
    %112 = arith.truncf %111 : vector<8x32xf32> to vector<8x32xbf16>
    %cst_27 = arith.constant dense<0.000000e+00> : vector<8x32xf32>
    %113 = tpu.matmul %112, %10, %cst_27 {dimension_numbers = #tpu.dot_dimension_numbers<[1], [0], [0], [1], [0, 0, 1, 1], [], []>} : vector<8x32xbf16>, vector<32x32xbf16>, vector<8x32xf32> -> vector<8x32xf32>
    %114 = vector.broadcast %15 : vector<1x32xf32> to vector<8x32xf32>
    %115 = arith.addf %113, %114 : vector<8x32xf32>
    %116 = arith.addf %76, %115 : vector<8x32xf32>
    %cst_28 = arith.constant dense<0.000000e+00> : vector<8xf32>
    %117 = vector.multi_reduction <add>, %116, %cst_28 [1] : vector<8x32xf32> to vector<8xf32>
    %118 = vector.shape_cast %117 : vector<8xf32> to vector<8x1xf32>
    %cst_29 = arith.constant 3.200000e+01 : f32
    %119 = vector.broadcast %cst_29 : f32 to vector<8x1xf32>
    %120 = arith.divf %118, %119 : vector<8x1xf32>
    %121 = vector.broadcast %120 : vector<8x1xf32> to vector<8x32xf32>
    %122 = arith.subf %116, %121 : vector<8x32xf32>
    %123 = arith.mulf %122, %122 : vector<8x32xf32>
    %cst_30 = arith.constant dense<0.000000e+00> : vector<8xf32>
    %124 = vector.multi_reduction <add>, %123, %cst_30 [1] : vector<8x32xf32> to vector<8xf32>
    %125 = vector.shape_cast %124 : vector<8xf32> to vector<8x1xf32>
    %cst_31 = arith.constant 3.200000e+01 : f32
    %126 = vector.broadcast %cst_31 : f32 to vector<8x1xf32>
    %127 = arith.divf %125, %126 : vector<8x1xf32>
    %cst_32 = arith.constant 9.99999974E-6 : f32
    %128 = vector.broadcast %cst_32 : f32 to vector<8x1xf32>
    %129 = arith.addf %127, %128 : vector<8x1xf32>
    %130 = math.rsqrt %129 : vector<8x1xf32>
    %131 = vector.broadcast %130 : vector<8x1xf32> to vector<8x32xf32>
    %132 = arith.mulf %122, %131 : vector<8x32xf32>
    %133 = vector.broadcast %20 : vector<1x32xf32> to vector<8x32xf32>
    %134 = arith.mulf %132, %133 : vector<8x32xf32>
    %135 = vector.broadcast %21 : vector<1x32xf32> to vector<8x32xf32>
    %136 = arith.addf %134, %135 : vector<8x32xf32>
    %137 = arith.truncf %136 : vector<8x32xf32> to vector<8x32xbf16>
    %cst_33 = arith.constant dense<0.000000e+00> : vector<8x64xf32>
    %138 = tpu.matmul %137, %11, %cst_33 {dimension_numbers = #tpu.dot_dimension_numbers<[1], [0], [0], [1], [0, 0, 1, 1], [], []>} : vector<8x32xbf16>, vector<32x64xbf16>, vector<8x64xf32> -> vector<8x64xf32>
    %139 = vector.broadcast %16 : vector<1x64xf32> to vector<8x64xf32>
    %140 = arith.addf %138, %139 : vector<8x64xf32>
    %cst_34 = arith.constant 0.000000e+00 : f32
    %141 = vector.broadcast %cst_34 : f32 to vector<8x64xf32>
    %142 = arith.maximumf %140, %141 : vector<8x64xf32>
    %143 = arith.truncf %142 : vector<8x64xf32> to vector<8x64xbf16>
    %cst_35 = arith.constant dense<0.000000e+00> : vector<8x32xf32>
    %144 = tpu.matmul %143, %5, %cst_35 {dimension_numbers = #tpu.dot_dimension_numbers<[1], [0], [0], [1], [0, 0, 1, 1], [], []>} : vector<8x64xbf16>, vector<64x32xbf16>, vector<8x32xf32> -> vector<8x32xf32>
    %145 = vector.broadcast %17 : vector<1x32xf32> to vector<8x32xf32>
    %146 = arith.addf %144, %145 : vector<8x32xf32>
    %147 = arith.addf %136, %146 : vector<8x32xf32>
    %cst_36 = arith.constant dense<0.000000e+00> : vector<8xf32>
    %148 = vector.multi_reduction <add>, %147, %cst_36 [1] : vector<8x32xf32> to vector<8xf32>
    %149 = vector.shape_cast %148 : vector<8xf32> to vector<8x1xf32>
    %cst_37 = arith.constant 3.200000e+01 : f32
    %150 = vector.broadcast %cst_37 : f32 to vector<8x1xf32>
    %151 = arith.divf %149, %150 : vector<8x1xf32>
    %152 = vector.broadcast %151 : vector<8x1xf32> to vector<8x32xf32>
    %153 = arith.subf %147, %152 : vector<8x32xf32>
    %154 = arith.mulf %153, %153 : vector<8x32xf32>
    %cst_38 = arith.constant dense<0.000000e+00> : vector<8xf32>
    %155 = vector.multi_reduction <add>, %154, %cst_38 [1] : vector<8x32xf32> to vector<8xf32>
    %156 = vector.shape_cast %155 : vector<8xf32> to vector<8x1xf32>
    %cst_39 = arith.constant 3.200000e+01 : f32
    %157 = vector.broadcast %cst_39 : f32 to vector<8x1xf32>
    %158 = arith.divf %156, %157 : vector<8x1xf32>
    %cst_40 = arith.constant 9.99999974E-6 : f32
    %159 = vector.broadcast %cst_40 : f32 to vector<8x1xf32>
    %160 = arith.addf %158, %159 : vector<8x1xf32>
    %161 = math.rsqrt %160 : vector<8x1xf32>
    %162 = vector.broadcast %161 : vector<8x1xf32> to vector<8x32xf32>
    %163 = arith.mulf %153, %162 : vector<8x32xf32>
    %164 = vector.broadcast %22 : vector<1x32xf32> to vector<8x32xf32>
    %165 = arith.mulf %163, %164 : vector<8x32xf32>
    %166 = vector.broadcast %23 : vector<1x32xf32> to vector<8x32xf32>
    %167 = arith.addf %165, %166 : vector<8x32xf32>
    %c0_41 = arith.constant 0 : index
    %c0_42 = arith.constant 0 : index
    %c0_43 = arith.constant 0 : index
    %168 = vector.load %arg6[%c0_41, %c0_42, %c0_43] : memref<1x8x32xf32, #tpu.memory_space<vmem>>, vector<1x8x32xf32>
    %169 = vector.shape_cast %168 : vector<1x8x32xf32> to vector<8x32xf32>
    %170 = vector.shape_cast %167 : vector<8x32xf32> to vector<1x8x32xf32>
    tpu.vector_store %arg6[%c0_41, %c0_42, %c0_43], %170 {strides = array<i32>} : memref<1x8x32xf32, #tpu.memory_space<vmem>>, vector<1x8x32xf32>,
    return
  }
  func.func @transform_0(%arg0: i32) -> (i32, i32, i32) {
    %c0_i32 = arith.constant 0 : i32
    %c0_i32_0 = arith.constant 0 : i32
    %c0_i32_1 = arith.constant 0 : i32
    return %arg0, %c0_i32, %c0_i32_0 : i32, i32, i32
  }
  func.func @transform_1(%arg0: i32) -> (i32, i32, i32) {
    %c0_i32 = arith.constant 0 : i32
    %c0_i32_0 = arith.constant 0 : i32
    %c0_i32_1 = arith.constant 0 : i32
    return %arg0, %c0_i32, %c0_i32_0 : i32, i32, i32
  }
  func.func @transform_2(%arg0: i32) -> (i32, i32) {
    %c0_i32 = arith.constant 0 : i32
    %c0_i32_0 = arith.constant 0 : i32
    %c0_i32_1 = arith.constant 0 : i32
    return %c0_i32, %c0_i32_0 : i32, i32
  }
  func.func @transform_3(%arg0: i32) -> (i32, i32) {
    %c0_i32 = arith.constant 0 : i32
    %c0_i32_0 = arith.constant 0 : i32
    %c0_i32_1 = arith.constant 0 : i32
    return %c0_i32, %c0_i32_0 : i32, i32
  }
  func.func @transform_4(%arg0: i32) -> (i32, i32) {
    %c0_i32 = arith.constant 0 : i32
    %c0_i32_0 = arith.constant 0 : i32
    %c0_i32_1 = arith.constant 0 : i32
    return %c0_i32, %c0_i32_0 : i32, i32
  }
  func.func @transform_5(%arg0: i32) -> (i32, i32, i32) {
    %c0_i32 = arith.constant 0 : i32
    %c0_i32_0 = arith.constant 0 : i32
    %c0_i32_1 = arith.constant 0 : i32
    return %arg0, %c0_i32, %c0_i32_0 : i32, i32, i32
  }
}

</mosaic_0001>

<bundles_post_ra>
// kernel: tpu_custom_call.1
= control target key start
LH: loop header
LB: loop body
LE: loop exit
PB: predicated region body
PF: predicated region fallthrough
CT: control target
= control target key end

     0   :  { %10 = vsyncpa [#allocation3], 0  ;;  %s3571_s0 = inlined_call_operand.vmem [shape: f32[2,8,32], index: 0, kind: input, shape index: {}]   ;;  %s3572_s1 = inlined_call_operand.vmem [shape: f32[2,8,32], index: 1, kind: input, shape index: {}]   ;;  %s3573_s2 = inlined_call_operand.hbm [shape: bf16[32,640], index: 2, kind: input, shape index: {}]   ;;  %s3574_s3 = inlined_call_operand.vmem [shape: bf16[64,32], index: 3, kind: input, shape index: {}]   ;;  %s3575_s4 = inlined_call_operand.vmem [shape: f32[12,128], index: 4, kind: input, shape index: {}]   ;;  %s3576_s5 = inlined_call_operand.hbm [shape: f32[2,8,32], index: 5, kind: output, shape index: {}]  }
   0x1   :  { %11 = vsyncpa [#allocation4], 0 }
   0x2   :  { %13 = vsyncpa [#allocation4 + $0x1], 0  ;;  %s3111_s18 = smov 0   ;;  %s3113_s19 = smov 0  }
   0x3   :  { %s3115_s20 = smov 0   ;;  %s3117_s21 = smov 0  }
   0x4 LB: > { %s3132_s22 = sadd.s32 4294967295, %s3063_s21   ;;  %s2582_s23 = sadd.s32 4294967294, %s3063_s21   ;;  %s3063_s21 = sphi %s3117_s21, %s3592_s21   ;;  %s3059_s20 = sphi %s3115_s20, %s3591_s20   ;;  %s3055_s19 = sphi %s3113_s19, %s3590_s19   ;;  %s3051_s18 = sphi %s3111_s18, %s3589_s18  }
   0x5   : > { %s3136_s24 = sadd.s32 1, %s3063_s21   ;;  %s141_s25 = sadd.s32 1, %s3059_s20 }
   0x6   : > { %s138_s26 = ssub.s32 %s3063_s21, %s3136_s24  ;;  %p151_p0 = scmp.ne.s32.totalorder %s3059_s20, %s3055_s19 }
   0x7   : > { %p139_p1 = scmp.eq.s32.totalorder %s138_s26, 0  ;;  %p152_p2 = scmp.eq.s32.totalorder %s3132_s22, 1 }
   0x8   : > { %p157_p3 = scmp.ne.s32.totalorder %s3055_s19, %s3051_s18  ;;  %p158_p4 = scmp.eq.s32.totalorder %s2582_s23, 1 }
   0x9   : > { %s3147_s27 = scalar_select %p139_p1, %s3059_s20, %s141_s25  }
   0xa   : > { %p3149_p5 = por %p152_p2, %p151_p0  ;;  %p3153_p6 = por %p158_p4, %p157_p3 }
   0xb   : > { %p2583_p7 = scmp.ge.s32.totalorder %s3063_s21, 1  ;;  %p165_p8 = scmp.lt.s32.totalorder %s3063_s21, 3 }
   0xc   : > { %s3580_s28 = scalar_select %p3149_p5, 1, 0 }
   0xd   : > { %s3581_s29 = scalar_select %p3153_p6, 1, 0 }
   0xe   : > { %p3577_p9 = scmp.eq.s32.totalorder %s3132_s22, 0  ;;  %p3160_p10 = pnand %p2583_p7, %p165_p8 }
   0xf   : > { %s3065_s6 = smov [#allocation2]   ;;  %s2969_s11 = scalar_lea.hbm %s3573_s2, 1280 }
  0x10   : > { %s3582_s30 = scalar_select %p3160_p10, 1, 0 }
  0x11   : > { %s177_s7 = sshll.u32 %s3065_s6, 4  ;;  %p2853_p11 = pneg %p3160_p10  ;;  %s178_s7 = int_to_ptr.vmem [resolvable:$true] %s177_s7 }
  0x12   : > { %p2970_p13 = scmp.ne.s32.totalorder %s3573_s2, %s2969_s11  ;;  %p2976_p3 = scmp.lt.u32.totalorder %s2969_s11, %s3573_s2 }
  0x13   : > { %p3168_p12 = pnand %p3577_p9, %p2853_p11 }
  0x15   : > { %p2971_p0 = pneg %p3168_p12 }
  0x17   : > { %p2972_p1 = pnand %p2971_p0, %p2970_p13 }
  0x19   : > { %p2973_p2 = pneg %p2972_p1 }
  0x1b   : > { %p2978_p4 = pnand %p2976_p3, %p2973_p2 }
  0x1d   : > { %2981 = shalt.err (!%p2978_p4)
}
  0x1e   : > { %s2982_s16 = scalar_lea.vmem %s178_s7, 1280  ;;  %p2990_p9 = scmp.lt.s32.totalorder %s178_s7, %s178_s7 }
  0x1f   : > { %p2983_p7 = scmp.ne.s32.totalorder %s178_s7, %s2982_s16  ;;  %p2991_p6 = scmp.lt.s32.totalorder %s2982_s16, %s2982_s16 }
  0x21   : > { %p2985_p8 = pnand %p2983_p7, %p2971_p0  ;;  %p2992_p5 = por %p2991_p6, %p2990_p9 }
  0x23   : > { %p2986_p11 = pneg %p2985_p8 }
  0x25   : > { %p2993_p10 = pnand %p2992_p5, %p2986_p11 }
  0x27   : > { %2996 = shalt.err (!%p2993_p10)
}
  0x28   : > { %s3066_s17 = smov 320   ;;  %s3067_s23 = smov 20  }
  0x29   : > { %2856 = dma.hbm_to_vmem [thread:$0]  (!%p3168_p12), %s3573_s2, 1280, %s178_s7, [#allocation3], %s3066_s17, %s3066_s17, %s3067_s23  }
  0x2a   : > { %p3584_p13 = scmp.ne.s32.totalorder %s3582_s30, 0 }
  0x2b   : > { %p3585_p1 = scmp.eq.s32.totalorder (!%p3584_p13), %s3132_s22, 0 }
  0x2c   : > { %213 = sbr.rel (%p3584_p13) target bundleno = 4979 (0x1373), region = 40 }
  0x33   : > { %3042 = dma.done.wait (%p3585_p1), [#allocation3], 1280   ;;  %p3586_p0 = pmov %p3585_p1 }
  0x34   : > { %p244_p5 = scmp.lt.s32.totalorder %s3132_s22, 1  ;;  %v3068_v0 = vmov 0.0   ;;  %vm3069_vm0 = vmmov 0   ;;  %v2912_v1 = vld [vmem:[#allocation2] ss:$20 sps:$4 sm:$0xff]   ;;  %vm294_vm1 = vcmask 261120   ;;  %v278_v5 = vlaneseq }
  0x35   : > { %3044 = vsyncadd (%p3586_p0), [#allocation3], 4294966016  ;;  %2691 = vmatprep.subr.bf16.mxu0 %v3068_v0  ;;  %2695 = vmatprep.mubr.msk.bf16.mxu0 %vm3069_vm0, %v3068_v0  ;;  %v2915_v2 = vld [vmem:[#allocation2 + $0x28] ss:$20 sps:$4 sm:$0xff]   ;;  %v3225_v8 = vld [vmem:[%s3575_s4] sm:$0xff]  ;;  %s3070_s12 = smov 104  }
  0x36   : > { %s3199_s6 = scalar_select %p244_p5, %s3132_s22, 1  ;;  %2705 = vmatprep.subr.bf16.mxu1 %v3068_v0  ;;  %2707 = vmatprep.mubr.msk.bf16.mxu1 %vm3069_vm0, %v3068_v0  ;;  %v3219_v6 = vshrl.u32 %v278_v5, 7  ;;  %vm426_vm2 = vcmask 1043456   ;;  %vm422_vm3 = vcmask 64512   ;;  %vm1193_vm4 = vcmask 130048  }
  0x37   : > { %2692 = vmatpush3.bf16.msra.mxu0 %v2912_v1  ;;  %s3071_s13 = smov 120   ;;  %s3072_s14 = smov 96   ;;  %vm1195_vm5 = vcmask 195584   ;;  %vm2416_vm6 = vcmask 523264  }
  0x38   : > { %s2589_s30 = sshll.u32 %s3199_s6, 3  ;;  %2693 = vmatprep.subr.bf16.mxu0 %v3068_v0  ;;  %v280_v7 = vsub.s32 0, %v3219_v6  ;;  %s3073_s15 = smov 112  }
  0x39   : > { %s247_s9 = scalar_lea.vmem %s3571_s0, %s2589_s30  ;;  %s3074_s16 = smov 64  }
  0x3a   : > { %v3210_v3 = vld [vmem:[%s247_s9] sm:$0xff]  ;;  %v281_v9 = vrot.slane %v3225_v8, %v280_v7  ;;  %s3077_s17 = smov 16   ;;  %s3078_s23 = smov 8  }
  0x3b   : > { %v277_v4 = vpack.c.bf16 %v3210_v3, %v3210_v3  ;;  %2694 = vmatpush3.bf16.msra.mxu0 %v2915_v2  ;;  %s3079_s25 = smov 24   ;;  %s251_s8 = scalar_lea.vmem %s3572_s1, %s2589_s30 }
  0x3c   : > { %2699 = vmatprep.subr.bf16.mxu0 %v3068_v0  ;;  %s2633_s7 = sshll.u32 %s3132_s22, 7  ;;  %p3587_p9 = scmp.ne.s32.totalorder %s3580_s28, 0 }
  0x3d   : > { %s3528_s10 = scalar_lea.hbm %s3576_s5, %s2633_s7  ;;  %s3080_s22 = smov [#allocation5]  }
  0x3e   : > { %2696 = vmatmul.mubr.msk.bf16.vlgmr.msra.gmra.mrb[0].mxu0 %vm294_vm1, %v277_v4 }
  0x3f   : > { %2701 = vmatprep.mubr.msk.bf16.mxu0 %vm3069_vm0, %v3068_v0 }
 0x111   : > { %v332_v10 = vpop.f32.mrb[0].mxu0 }
 0x112   : > { %v333_v11 = vadd.f32 %v332_v10, %v281_v9  ;;  %v2697_v12 = vpop.f32.mrb[1].mxu0 }
 0x113   : > { %v335_v13 = vpop.f32.mrb[2].mxu0 }
 0x114   : > { %v3230_v14 = vpack.c.bf16 %v333_v11, %v333_v11  ;;  %v2698_v15 = vpop.f32.mrb[3].mxu0 }
 0x116   : > { %344 = vrot.lane.b32.xlu1 %v3230_v14, %s3070_s12  ;;  %340 = vrot.lane.b32.xlu0 %v3230_v14, %s3071_s13 }
 0x11a   : > { %346 = vrot.lane.b32.xlu1 %v3230_v14, %s3072_s14  ;;  %342 = vrot.lane.b32.xlu0 %v3230_v14, %s3073_s15 }
 0x188   : > { %v3240_v16 = vpop.permute.xlu0 %340  ;;  %v3244_v17 = vpop.permute.xlu1 %344 }
 0x189   : > { %348 = vrot.lane.b32.xlu0 %v3240_v16, %s3072_s14 }
 0x18c   : > { %v3246_v18 = vpop.permute.xlu0 %342  ;;  %v347_v19 = vpop.permute.xlu1 %346 }
 0x18d   : > { %352 = vrot.lane.b32.xlu0 %v3244_v17, %s3072_s14  ;;  %350 = vrot.lane.b32.xlu1 %v3246_v18, %s3072_s14 }
 0x1b0   : > { %358 = vxpose.xlu1.c.b16.start.end [1/1] (short) (narrow) %v347_v19, 16 }
 0x1fb   : > { %v349_v20 = vpop.permute.xlu0 %348 }
 0x1fc   : > { %374 = vxpose.xlu0.c.b16.start.end [1/1] (short) (narrow) %v349_v20, 16 }
 0x1ff   : > { %v351_v21 = vpop.permute.xlu1 %350  ;;  %v353_v22 = vpop.permute.xlu0 %352 }
 0x200   : > { %390 = vxpose.xlu0.c.b16.start.end [1/1] (short) (narrow) %v351_v21, 16  ;;  %406 = vxpose.xlu1.c.b16.start.end [1/1] (short) (narrow) %v353_v22, 16 }
 0x216   : > { %v366_v23 = vpop.trf.xlu1 }
 0x217   : > { %v428_v24 = vsel %vm426_vm2, %v366_v23, 0 }
 0x218   : > { %2700 = vmatpush3.bf16.msra.mxu0 %v428_v24 }
 0x219   : > { %2711 = vmatprep.subr.bf16.mxu0 %v3068_v0 }
 0x21b   : > { %2702 = vmatmul.mubr.msk.bf16.vlgmr.msra.gmra.mrb[4].mxu0 %vm422_vm3, %v3230_v14 }
 0x21c   : > { %2713 = vmatprep.mubr.msk.bf16.mxu0 %vm3069_vm0, %v3068_v0 }
 0x262   : > { %v382_v25 = vpop.trf.xlu0 }
 0x263   : > { %v474_v26 = vsel %vm426_vm2, %v382_v25, 0 }
 0x264   : > { %2706 = vmatpush3.bf16.msra.mxu1 %v474_v26 }
 0x265   : > { %2717 = vmatprep.subr.bf16.mxu1 %v3068_v0 }
 0x266   : > { %v398_v27 = vpop.trf.xlu0  ;;  %v414_v28 = vpop.trf.xlu1 }
 0x267   : > { %v520_v29 = vsel %vm426_vm2, %v398_v27, 0  ;;  %2708 = vmatmul.mubr.msk.bf16.vlgmr.msra.gmra.mrb[0].mxu1 %vm422_vm3, %v3240_v16  ;;  %v566_v30 = vsel %vm426_vm2, %v414_v28, 0 }
 0x268   : > { %2712 = vmatpush3.bf16.msra.mxu0 %v520_v29  ;;  %2718 = vmatpush3.bf16.msra.mxu1 %v566_v30 }
 0x269   : > { %2719 = vmatprep.mubr.msk.bf16.mxu1 %vm3069_vm0, %v3068_v0  ;;  %2723 = vmatprep.subr.bf16.mxu0 %v3068_v0 }
 0x26a   : > { %2729 = vmatprep.subr.bf16.mxu1 %v3068_v0 }
 0x26b   : > { %2714 = vmatmul.mubr.msk.bf16.vlgmr.msra.gmra.mrb[8].mxu0 %vm422_vm3, %v3246_v18 }
 0x26c   : > { %2725 = vmatprep.mubr.msk.bf16.mxu0 %vm3069_vm0, %v3068_v0 }
 0x26f   : > { %2720 = vmatmul.mubr.msk.bf16.vlgmr.msra.gmra.mrb[4].mxu1 %vm422_vm3, %v3244_v17 }
 0x270   : > { %2731 = vmatprep.mubr.msk.bf16.mxu1 %vm3069_vm0, %v3068_v0 }
 0x2ee   : > { %v464_v31 = vpop.f32.mrb[4].mxu0 }
 0x2ef   : > { %v2703_v32 = vpop.f32.mrb[5].mxu0  ;;  %v608_v33 = vsel %vm422_vm3, %v464_v31, -inf }
 0x2f0   : > { %609 = vmax.xlane.f32.xlu0 %v608_v33  ;;  %v467_v34 = vpop.f32.mrb[6].mxu0 }
 0x2f1   : > { %v2704_v35 = vpop.f32.mrb[7].mxu0 }
 0x33a   : > { %v510_v36 = vpop.f32.mrb[0].mxu1 }
 0x33b   : > { %v2709_v37 = vpop.f32.mrb[1].mxu1  ;;  %v611_v38 = vsel %vm422_vm3, %v510_v36, -inf }
 0x33c   : > { %612 = vmax.xlane.f32.xlu1 %v611_v38  ;;  %v513_v39 = vpop.f32.mrb[2].mxu1 }
 0x33d   : > { %v2710_v40 = vpop.f32.mrb[3].mxu1  ;;  %v2914_v39 = vld [vmem:[#allocation2 + $0x4] ss:$20 sps:$4 sm:$0xff]  }
 0x33e   : > { %v556_v41 = vpop.f32.mrb[8].mxu0 }
 0x33f   : > { %v2715_v42 = vpop.f32.mrb[9].mxu0  ;;  %v614_v43 = vsel %vm422_vm3, %v556_v41, -inf }
 0x340   : > { %615 = vmax.xlane.f32.xlu0 %v614_v43  ;;  %v559_v44 = vpop.f32.mrb[10].mxu0 }
 0x341   : > { %v2716_v45 = vpop.f32.mrb[11].mxu0 }
 0x342   : > { %v602_v46 = vpop.f32.mrb[4].mxu1 }
 0x343   : > { %v2721_v47 = vpop.f32.mrb[5].mxu1  ;;  %v617_v48 = vsel %vm422_vm3, %v602_v46, -inf }
 0x344   : > { %618 = vmax.xlane.f32.xlu1 %v617_v48  ;;  %v605_v49 = vpop.f32.mrb[6].mxu1 }
 0x345   : > { %v2722_v50 = vpop.f32.mrb[7].mxu1 }
 0x355   : > { %658 = vrot.lane.b32.xlu1 %v3240_v16, %s3074_s16 }
 0x356   : > { %656 = vrot.lane.b32.xlu0 %v3230_v14, %s3074_s16 }
 0x37d   : > { %v610_v51 = vpop.xlane.xlu0 %609 }
 0x37e   : > { %v620_v52 = vsub.f32 %v464_v31, %v610_v51 }
 0x380   : > { %v624_v53 = vmul.f32 1.442695, %v620_v52 }
 0x382   : > { %2930 = vpow2.f32 %v624_v53 }
 0x38c   : > { %v2931_v54 = vpop.eup %2930 }
 0x38d   : > { %v632_v55 = vsel %vm422_vm3, %v2931_v54, 0.0 }
 0x38e   : > { %633 = vadd.xlane.f32.xlu1 %v632_v55 }
 0x39f   : > { %662 = vrot.lane.b32.xlu1 %v3244_v17, %s3074_s16 }
 0x3c9   : > { %v613_v56 = vpop.xlane.xlu1 %612 }
 0x3ca   : > { %v621_v57 = vsub.f32 %v510_v36, %v613_v56 }
 0x3cc   : > { %v626_v58 = vmul.f32 1.442695, %v621_v57 }
 0x3cd   : > { %v616_v59 = vpop.xlane.xlu0 %615 }
 0x3ce   : > { %2932 = vpow2.f32 %v626_v58  ;;  %v622_v60 = vsub.f32 %v556_v41, %v616_v59  ;;  %v2917_v41 = vld [vmem:[#allocation2 + $0x2c] ss:$20 sps:$4 sm:$0xff]   ;;  %v3075_v59 = vmov 1983009808  }
 0x3d0   : > { %v628_v61 = vmul.f32 1.442695, %v622_v60  ;;  %v1047_v60 = vunpack.c.l.s4 %v3075_v59 }
 0x3d1   : > { %v619_v4 = vpop.xlane.xlu1 %618 }
 0x3d2   : > { %2934 = vpow2.f32 %v628_v61  ;;  %v623_v5 = vsub.f32 %v602_v46, %v619_v4  ;;  %v3076_v61 = vmov 1934713408  }
 0x3d4   : > { %v630_v9 = vmul.f32 1.442695, %v623_v5 }
 0x3d5   : > { %v659_v10 = vpop.permute.xlu1 %658 }
 0x3d6   : > { %2936 = vpow2.f32 %v630_v9 }
 0x3d8   : > { %v2933_v62 = vpop.eup %2932 }
 0x3d9   : > { %v635_v63 = vsel %vm422_vm3, %v2933_v62, 0.0 }
 0x3da   : > { %636 = vadd.xlane.f32.xlu0 %v635_v63  ;;  %v1048_v63 = vunpack.c.0.s8 %v1047_v60 }
 0x3dc   : > { %v2935_v1 = vpop.eup %2934  ;;  %v3311_v5 = vsub.s32 %v1048_v63, %v3219_v6 }
 0x3dd   : > { %v638_v2 = vsel %vm422_vm3, %v2935_v1, 0.0 }
 0x3de   : > { %639 = vadd.xlane.f32.xlu1 %v638_v2 }
 0x3e0   : > { %v2937_v11 = vpop.eup %2936 }
 0x3e1   : > { %v641_v12 = vsel %vm422_vm3, %v2937_v11, 0.0 }
 0x3f0   : > { %660 = vrot.lane.b32.xlu0 %v3246_v18, %s3074_s16  ;;  %v657_v18 = vpop.permute.xlu0 %656 }
 0x40b   : > { %684 = vxpose.xlu1.c.b16.start.end [1/1] (short) (narrow) %v659_v10, 16 }
 0x40f   : > { %642 = vadd.xlane.f32.xlu0 %v641_v12 }
 0x41b   : > { %v634_v13 = vpop.xlane.xlu1 %633 }
 0x41c   : > { %2938 = vrcp.f32 %v634_v13 }
 0x41f   : > { %v663_v14 = vpop.permute.xlu1 %662 }
 0x420   : > { %716 = vxpose.xlu1.c.b16.start.end [1/1] (short) (narrow) %v663_v14, 16 }
 0x426   : > { %v2939_v15 = vpop.eup %2938 }
 0x427   : > { %v648_v16 = vmul.f32 %v2939_v15, %v2931_v54 }
 0x429   : > { %v652_v17 = vpack.c.bf16 %v648_v16, %v648_v16 }
 0x42b   : > { %v736_v19 = vsel %vm422_vm3, %v652_v17, 0 }
 0x42c   : > { %2724 = vmatpush3.bf16.xpose.msra.mxu0 %v736_v19 }
 0x42d   : > { %2735 = vmatprep.subr.bf16.mxu0 %v3068_v0 }
 0x43c   : > { %668 = vxpose.xlu0.c.b16.start.end [1/1] (short) (narrow) %v657_v18, 16 }
 0x467   : > { %v637_v20 = vpop.xlane.xlu0 %636 }
 0x468   : > { %2940 = vrcp.f32 %v637_v20 }
 0x46b   : > { %v661_v21 = vpop.permute.xlu0 %660  ;;  %v640_v26 = vpop.xlane.xlu1 %639 }
 0x46c   : > { %700 = vxpose.xlu0.c.b16.start.end [1/1] (short) (narrow) %v661_v21, 16  ;;  %2942 = vrcp.f32 %v640_v26 }
 0x471   : > { %v692_v27 = vpop.trf.xlu1 }
 0x472   : > { %v2941_v22 = vpop.eup %2940 }
 0x473   : > { %v649_v23 = vmul.f32 %v2941_v22, %v2933_v62  ;;  %v1079_v62 = vunpack.c.l.s4 %v3076_v61 }
 0x475   : > { %v653_v24 = vpack.c.bf16 %v649_v23, %v649_v23  ;;  %v1080_v2 = vunpack.c.0.s8 %v1079_v62 }
 0x476   : > { %v2943_v28 = vpop.eup %2942 }
 0x477   : > { %v782_v25 = vsel %vm422_vm3, %v653_v24, 0  ;;  %v650_v29 = vmul.f32 %v2943_v28, %v2935_v1  ;;  %v3314_v14 = vsub.s32 %v1080_v2, %v3219_v6 }
 0x478   : > { %2730 = vmatpush3.bf16.xpose.msra.mxu1 %v782_v25 }
 0x479   : > { %2741 = vmatprep.subr.bf16.mxu1 %v3068_v0  ;;  %v654_v31 = vpack.c.bf16 %v650_v29, %v650_v29 }
 0x47b   : > { %v828_v33 = vsel %vm422_vm3, %v654_v31, 0 }
 0x47f   : > { %2732 = vmatmul.mubr.msk.bf16.vlgmr.msra.gmra.mrb[8].mxu1 %vm422_vm3, %v692_v27 }
 0x480   : > { %2743 = vmatprep.mubr.msk.bf16.mxu1 %vm3069_vm0, %v3068_v0 }
 0x486   : > { %v724_v38 = vpop.trf.xlu1 }
 0x49c   : > { %v643_v30 = vpop.xlane.xlu0 %642 }
 0x49d   : > { %2944 = vrcp.f32 %v643_v30 }
 0x4a2   : > { %v676_v32 = vpop.trf.xlu0 }
 0x4a3   : > { %2726 = vmatmul.mubr.msk.bf16.vlgmr.msra.gmra.mrb[12].mxu0 %vm422_vm3, %v676_v32 }
 0x4a4   : > { %2736 = vmatpush3.bf16.xpose.msra.mxu0 %v828_v33  ;;  %2737 = vmatprep.mubr.msk.bf16.mxu0 %vm3069_vm0, %v3068_v0 }
 0x4a5   : > { %2747 = vmatprep.subr.bf16.mxu0 %v3068_v0 }
 0x4a7   : > { %v2945_v34 = vpop.eup %2944 }
 0x4a8   : > { %v651_v35 = vmul.f32 %v2945_v34, %v2937_v11 }
 0x4aa   : > { %v655_v36 = vpack.c.bf16 %v651_v35, %v651_v35 }
 0x4ac   : > { %v874_v37 = vsel %vm422_vm3, %v655_v36, 0 }
 0x4ad   : > { %2742 = vmatpush3.bf16.xpose.msra.mxu1 %v874_v37 }
 0x4ae   : > { %2755 = vmatprep.subr.bf16.mxu1 %v3068_v0 }
 0x4b4   : > { %2744 = vmatmul.mubr.msk.bf16.vlgmr.msra.gmra.mrb[12].mxu1 %vm422_vm3, %v724_v38 }
 0x4b5   : > { %2759 = vmatprep.mubr.msk.bf16.mxu1 %vm3069_vm0, %v3068_v0 }
 0x4d2   : > { %v708_v40 = vpop.trf.xlu0 }
 0x4d3   : > { %2738 = vmatmul.mubr.msk.bf16.vlgmr.msra.gmra.mrb[16].mxu0 %vm422_vm3, %v708_v40 }
 0x4d4   : > { %2748 = vmatpush3.bf16.msra.mxu0 %v2914_v39  ;;  %2751 = vmatprep.mubr.msk.bf16.mxu0 %vm3069_vm0, %v3068_v0 }
 0x4d5   : > { %2749 = vmatprep.subr.bf16.mxu0 %v3068_v0 }
 0x4d8   : > { %2750 = vmatpush3.bf16.msra.mxu0 %v2917_v41 }
 0x4d9   : > { %2763 = vmatprep.subr.bf16.mxu0 %v3068_v0 }
 0x552   : > { %v818_v42 = vpop.f32.mrb[8].mxu1 }
 0x553   : > { %v2733_v43 = vpop.f32.mrb[9].mxu1  ;;  %948 = vxpose.xlu1.b32.start.end [1/1] (short) (narrow) %v818_v42, 8 }
 0x554   : > { %v821_v44 = vpop.f32.mrb[10].mxu1 }
 0x555   : > { %v2734_v45 = vpop.f32.mrb[11].mxu1 }
 0x576   : > { %v772_v46 = vpop.f32.mrb[12].mxu0 }
 0x577   : > { %v2727_v47 = vpop.f32.mrb[13].mxu0  ;;  %916 = vxpose.xlu0.b32.start.end [1/1] (short) (narrow) %v772_v46, 8 }
 0x578   : > { %v775_v48 = vpop.f32.mrb[14].mxu0 }
 0x579   : > { %v2728_v49 = vpop.f32.mrb[15].mxu0 }
 0x587   : > { %v910_v50 = vpop.f32.mrb[12].mxu1 }
 0x588   : > { %v2745_v51 = vpop.f32.mrb[13].mxu1 }
 0x589   : > { %v913_v52 = vpop.f32.mrb[14].mxu1 }
 0x58a   : > { %v2746_v53 = vpop.f32.mrb[15].mxu1 }
 0x5a6   : > { %v864_v54 = vpop.f32.mrb[16].mxu0 }
 0x5a7   : > { %980 = vxpose.xlu0.b32.start.end [1/1] (short) (narrow) %v864_v54, 8  ;;  %v2739_v55 = vpop.f32.mrb[17].mxu0  ;;  %v2918_v54 = vld [vmem:[#allocation2 + $0x8] ss:$20 sps:$4 sm:$0xff]  }
 0x5a8   : > { %v867_v56 = vpop.f32.mrb[18].mxu0  ;;  %v2921_v55 = vld [vmem:[#allocation2 + $0x30] ss:$20 sps:$4 sm:$0xff]   ;;  %2756 = vmatpush3.bf16.msra.mxu1 %v2918_v54 }
 0x5a9   : > { %v2740_v57 = vpop.f32.mrb[19].mxu0  ;;  %2757 = vmatprep.subr.bf16.mxu1 %v3068_v0  ;;  %v1200_v56 = vsub.s32 1, %v3219_v6 }
 0x5ab   : > { %1012 = vxpose.xlu0.b32.start.end [1/1] (short) (narrow) %v910_v50, 8  ;;  %v1201_v57 = vrot.slane %v3225_v8, %v1200_v56 }
 0x5ac   : > { %2758 = vmatpush3.bf16.msra.mxu1 %v2921_v55 }
 0x5ad   : > { %2771 = vmatprep.subr.bf16.mxu1 %v3068_v0 }
 0x5d3   : > { %v964_v4 = vpop.trf.xlu1 }
 0x5f7   : > { %v932_v58 = vpop.trf.xlu0 }
 0x627   : > { %v996_v1 = vpop.trf.xlu0 }
 0x628   : > { %v1044_v9 = vcombine.low %v932_v58, %v996_v1  ;;  %v1045_v10 = vcombine.high %v932_v58, %v996_v1 }
 0x62a   : > { %v1052_v15 = vrot.slane %v1044_v9, %v3311_v5  ;;  %v1059_v16 = vrot.slane %v1045_v10, %v3311_v5  ;;  %v254_v9 = vld [vmem:[%s251_s8] sm:$0xff] }
 0x62b   : > { %v1028_v11 = vpop.trf.xlu0 }
 0x62c   : > { %v1060_v12 = vcombine.low %v964_v4, %v1028_v11  ;;  %v1061_v13 = vcombine.high %v964_v4, %v1028_v11  ;;  %v1281_v4 = vsub.s32 2, %v3219_v6  ;;  %v1338_v11 = vpack.c.bf16 %v254_v9, %v254_v9 }
 0x62e   : > { %v1068_v17 = vrot.slane %v1060_v12, %v3311_v5  ;;  %v1075_v19 = vrot.slane %v1061_v13, %v3311_v5  ;;  %v1282_v10 = vrot.slane %v3225_v8, %v1281_v4 }
 0x630   : > { %v1076_v18 = vcombine.low %v1052_v15, %v1068_v17  ;;  %v1077_v20 = vcombine.high %v1052_v15, %v1068_v17  ;;  %v1092_v21 = vcombine.low %v1059_v16, %v1075_v19  ;;  %v1093_v22 = vcombine.high %v1059_v16, %v1075_v19 }
 0x632   : > { %v1084_v23 = vrot.slane %v1076_v18, %v3314_v14  ;;  %v1091_v24 = vrot.slane %v1077_v20, %v3314_v14  ;;  %v1100_v25 = vrot.slane %v1092_v21, %v3314_v14  ;;  %v1107_v26 = vrot.slane %v1093_v22, %v3314_v14 }
 0x634   : > { %v1112_v27 = vcombine.low %v1084_v23, %v1091_v24  ;;  %v2602_v28 = vcombine.high %v1084_v23, %v1091_v24  ;;  %v1128_v29 = vcombine.low %v1100_v25, %v1107_v26  ;;  %v2603_v30 = vcombine.high %v1100_v25, %v1107_v26 }
 0x636   : > { %v1119_v31 = vrot.slane %v1112_v27, %v3311_v5  ;;  %v1127_v32 = vrot.slane %v2602_v28, %v3311_v5  ;;  %v1135_v33 = vrot.slane %v1128_v29, %v3311_v5  ;;  %v1143_v34 = vrot.slane %v2603_v30, %v3311_v5 }
 0x637   : > { %v1270_v28 = vsub.s32 6, %v3219_v6  ;;  %v1275_v29 = vsub.s32 7, %v3219_v6 }
 0x638   : > { %v1145_v35 = vcombine.high %v1119_v31, %v1127_v32  ;;  %v1161_v36 = vcombine.high %v1135_v33, %v1143_v34  ;;  %v1144_v37 = vcombine.low %v1119_v31, %v1127_v32  ;;  %v1160_v38 = vcombine.low %v1135_v33, %v1143_v34 }
 0x639   : > { %v1271_v30 = vrot.slane %v3225_v8, %v1270_v28  ;;  %v1276_v33 = vrot.slane %v3225_v8, %v1275_v29 }
 0x63a   : > { %v1159_v39 = vrot.slane %v1145_v35, %v3314_v14  ;;  %v1175_v40 = vrot.slane %v1161_v36, %v3314_v14  ;;  %v1152_v41 = vrot.slane %v1144_v37, %v3314_v14  ;;  %v1168_v42 = vrot.slane %v1160_v38, %v3314_v14 }
 0x63c   : > { %v1178_v43 = vcombine.low %v1159_v39, %v1175_v40  ;;  %v1177_v44 = vcombine.high %v1152_v41, %v1168_v42  ;;  %v1176_v45 = vcombine.low %v1152_v41, %v1168_v42  ;;  %v1179_v46 = vcombine.high %v1159_v39, %v1175_v40 }
 0x63e   : > { %1185 = vrot.lane.b32.xlu0 %v1178_v43, %s3077_s17  ;;  %1181 = vrot.lane.b32.xlu1 %v1177_v44, %s3078_s23 }
 0x642   : > { %1189 = vrot.lane.b32.xlu1 %v1179_v46, %s3079_s25  ;;  %1339 = vrot.lane.b32.xlu0 %v2918_v54, %s3072_s14 }
 0x646   : > { %1341 = vrot.lane.b32.xlu0 %v2921_v55, %s3072_s14 }
 0x6b0   : > { %v1182_v47 = vpop.permute.xlu1 %1181  ;;  %v1186_v48 = vpop.permute.xlu0 %1185 }
 0x6b1   : > { %v1192_v49 = vsel %vm422_vm3, %v1176_v45, %v1182_v47 }
 0x6b2   : > { %v1194_v51 = vsel %vm1193_vm4, %v1192_v49, %v1186_v48 }
 0x6b4   : > { %v1190_v50 = vpop.permute.xlu1 %1189  ;;  %v1340_v2 = vpop.permute.xlu0 %1339 }
 0x6b5   : > { %v1196_v52 = vsel %vm1195_vm5, %v1194_v51, %v1190_v50 }
 0x6b6   : > { %v1197_v53 = vpack.c.bf16 %v1196_v52, %v1196_v52 }
 0x6b8   : > { %2752 = vmatmul.mubr.msk.bf16.vlgmr.msra.gmra.mrb[20].mxu0 %vm294_vm1, %v1197_v53 }
 0x6b9   : > { %2767 = vmatprep.mubr.msk.bf16.mxu0 %vm3069_vm0, %v3068_v0  ;;  %2764 = vmatpush3.bf16.msra.mxu0 %v1340_v2 }
 0x6ba   : > { %2765 = vmatprep.subr.bf16.mxu0 %v3068_v0 }
 0x78b   : > { %v1247_v58 = vpop.f32.mrb[20].mxu0 }
 0x78c   : > { %v1248_v59 = vadd.f32 %v1247_v58, %v1201_v57  ;;  %v2753_v60 = vpop.f32.mrb[21].mxu0 }
 0x78d   : > { %v1250_v61 = vpop.f32.mrb[22].mxu0 }
 0x78e   : > { %v2754_v62 = vpop.f32.mrb[23].mxu0  ;;  %v1253_v63 = vadd.f32 %v1248_v59, %v3210_v3  ;;  %v1342_v3 = vpop.permute.xlu0 %1341 }
 0x78f   : > { %2766 = vmatpush3.bf16.msra.mxu0 %v1342_v3 }
 0x790   : > { %v1254_v1 = vsel %vm294_vm1, %v1253_v63, 0.0  ;;  %2777 = vmatprep.subr.bf16.mxu0 %v3068_v0 }
 0x791   : > { %1255 = vadd.xlane.f32.xlu1 %v1254_v1 }
 0x792   : > { %2768 = vmatmul.mubr.msk.bf16.vlgmr.msra.gmra.mrb[24].mxu0 %vm294_vm1, %v1338_v11 }
 0x793   : > { %2779 = vmatprep.mubr.msk.bf16.mxu0 %vm3069_vm0, %v3068_v0 }
 0x7a2   : > { %1346 = vrot.lane.b32.xlu1 %v1282_v10, %s3072_s14 }
 0x81e   : > { %v1256_v12 = vpop.xlane.xlu1 %1255 }
 0x81f   : > { %v1258_v13 = vmul.f32 0.03125, %v1256_v12 }
 0x821   : > { %v1259_v15 = vsub.f32 %v1253_v63, %v1258_v13 }
 0x822   : > { %v1347_v19 = vpop.permute.xlu1 %1346 }
 0x823   : > { %v1260_v16 = vmul.f32 %v1259_v15, %v1259_v15 }
 0x825   : > { %v1261_v17 = vsel %vm294_vm1, %v1260_v16, 0.0 }
 0x826   : > { %1262 = vadd.xlane.f32.xlu0 %v1261_v17 }
 0x865   : > { %v1386_v18 = vpop.f32.mrb[24].mxu0 }
 0x866   : > { %v1387_v20 = vadd.f32 %v1386_v18, %v1347_v19  ;;  %v2769_v21 = vpop.f32.mrb[25].mxu0 }
 0x867   : > { %v1389_v22 = vpop.f32.mrb[26].mxu0 }
 0x868   : > { %v3367_v23 = vpack.c.bf16 %v1387_v20, %v1387_v20  ;;  %v2770_v24 = vpop.f32.mrb[27].mxu0 }
 0x86a   : > { %1405 = vrot.lane.b32.xlu1 %v3367_v23, %s3073_s15  ;;  %1402 = vrot.lane.b32.xlu0 %v3367_v23, %s3071_s13 }
 0x86e   : > { %1408 = vrot.lane.b32.xlu1 %v3367_v23, %s3070_s12 }
 0x891   : > { %1411 = vxpose.xlu1.c.b16.start.end [1/1] (short) (narrow) %v3367_v23, 16 }
 0x8b3   : > { %v1263_v25 = vpop.xlane.xlu0 %1262 }
 0x8b4   : > { %v1264_v26 = vmul.f32 0.03125, %v1263_v25 }
 0x8b6   : > { %v1265_v27 = vadd.f32 1e-05, %v1264_v26 }
 0x8b8   : > { %2946 = vrsqrt.f32 %v1265_v27 }
 0x8c2   : > { %v2947_v31 = vpop.eup %2946 }
 0x8c3   : > { %v1267_v32 = vmul.f32 %v2947_v31, %v1259_v15 }
 0x8c5   : > { %v1272_v34 = vmul.f32 %v1271_v30, %v1267_v32 }
 0x8c7   : > { %v3380_v35 = vadd.f32 %v1276_v33, %v1272_v34 }
 0x8c9   : > { %v1278_v36 = vpack.c.bf16 %v3380_v35, %v3380_v35 }
 0x8cb   : > { %2760 = vmatmul.mubr.msk.bf16.vlgmr.msra.gmra.mrb[16].mxu1 %vm294_vm1, %v1278_v36 }
 0x8cc   : > { %2773 = vmatprep.mubr.msk.bf16.mxu1 %vm3069_vm0, %v3068_v0 }
 0x8dc   : > { %v3387_v37 = vpop.permute.xlu0 %1402  ;;  %v3390_v38 = vpop.permute.xlu1 %1405 }
 0x8dd   : > { %1427 = vxpose.xlu0.c.b16.start.end [1/1] (short) (narrow) %v3387_v37, 16 }
 0x8e0   : > { %v3392_v39 = vpop.permute.xlu1 %1408 }
 0x8f7   : > { %v1419_v8 = vpop.trf.xlu1 }
 0x8f8   : > { %v1479_v40 = vsel %vm426_vm2, %v1419_v8, 0 }
 0x8f9   : > { %2772 = vmatpush3.bf16.msra.mxu1 %v1479_v40 }
 0x8fa   : > { %2783 = vmatprep.subr.bf16.mxu1 %v3068_v0 }
 0x943   : > { %v1435_v41 = vpop.trf.xlu0 }
 0x944   : > { %v1525_v42 = vsel %vm426_vm2, %v1435_v41, 0 }
 0x945   : > { %2778 = vmatpush3.bf16.msra.mxu0 %v1525_v42 }
 0x946   : > { %2789 = vmatprep.subr.bf16.mxu0 %v3068_v0 }
 0x99e   : > { %v1332_v43 = vpop.f32.mrb[16].mxu1 }
 0x99f   : > { %v1333_v44 = vadd.f32 %v1332_v43, %v1282_v10  ;;  %v2761_v45 = vpop.f32.mrb[17].mxu1 }
 0x9a0   : > { %v1335_v46 = vpop.f32.mrb[18].mxu1 }
 0x9a1   : > { %v1392_v47 = vpack.c.bf16 %v1333_v44, %v1333_v44  ;;  %v2762_v48 = vpop.f32.mrb[19].mxu1 }
 0x9a3   : > { %1394 = vrot.lane.b32.xlu1 %v1392_v47, %s3071_s13  ;;  %2774 = vmatmul.mubr.msk.bf16.vlgmr.msra.gmra.mrb[20].mxu1 %vm422_vm3, %v1392_v47  ;;  %s3001_s13 = sshll.u32 %s3080_s22, 4  ;;  %s3002_s13 = int_to_ptr.vmem [resolvable:$false] %s3001_s13 }
 0x9a4   : > { %1398 = vrot.lane.b32.xlu0 %v1392_v47, %s3070_s12  ;;  %2785 = vmatprep.mubr.msk.bf16.mxu1 %vm3069_vm0, %v3068_v0 }
 0x9a7   : > { %1396 = vrot.lane.b32.xlu1 %v1392_v47, %s3073_s15 }
 0x9c2   : > { %1443 = vxpose.xlu0.c.b16.start.end [1/1] (short) (narrow) %v3390_v38, 16 }
 0x9ca   : > { %1459 = vxpose.xlu1.c.b16.start.end [1/1] (short) (narrow) %v3392_v39, 16 }
 0xa15   : > { %v1395_v49 = vpop.permute.xlu1 %1394 }
 0xa16   : > { %2780 = vmatmul.mubr.msk.bf16.vlgmr.msra.gmra.mrb[28].mxu0 %vm422_vm3, %v1395_v49  ;;  %v1399_v50 = vpop.permute.xlu0 %1398 }
 0xa17   : > { %2791 = vmatprep.mubr.msk.bf16.mxu0 %vm3069_vm0, %v3068_v0 }
 0xa19   : > { %v1397_v53 = vpop.permute.xlu1 %1396 }
 0xa28   : > { %v1451_v51 = vpop.trf.xlu0 }
 0xa29   : > { %v1571_v52 = vsel %vm426_vm2, %v1451_v51, 0 }
 0xa2a   : > { %2784 = vmatpush3.bf16.msra.mxu1 %v1571_v52 }
 0xa2b   : > { %2795 = vmatprep.subr.bf16.mxu1 %v3068_v0 }
 0xa2d   : > { %2786 = vmatmul.mubr.msk.bf16.vlgmr.msra.gmra.mrb[24].mxu1 %vm422_vm3, %v1397_v53 }
 0xa2e   : > { %2797 = vmatprep.mubr.msk.bf16.mxu1 %vm3069_vm0, %v3068_v0 }
 0xa30   : > { %v1467_v54 = vpop.trf.xlu1 }
 0xa31   : > { %v1617_v55 = vsel %vm426_vm2, %v1467_v54, 0 }
 0xa32   : > { %2790 = vmatpush3.bf16.msra.mxu0 %v1617_v55 }
 0xa33   : > { %2801 = vmatprep.subr.bf16.mxu0 %v3068_v0 }
 0xa35   : > { %2792 = vmatmul.mubr.msk.bf16.vlgmr.msra.gmra.mrb[32].mxu0 %vm422_vm3, %v1399_v50 }
 0xa36   : > { %2803 = vmatprep.mubr.msk.bf16.mxu0 %vm3069_vm0, %v3068_v0 }
 0xa76   : > { %v1515_v57 = vpop.f32.mrb[20].mxu1 }
 0xa77   : > { %v2775_v58 = vpop.f32.mrb[21].mxu1  ;;  %v1659_v59 = vsel %vm422_vm3, %v1515_v57, -inf }
 0xa78   : > { %v1518_v60 = vpop.f32.mrb[22].mxu1  ;;  %1660 = vmax.xlane.f32.xlu0 %v1659_v59 }
 0xa79   : > { %v2776_v61 = vpop.f32.mrb[23].mxu1 }
 0xae9   : > { %v1561_v62 = vpop.f32.mrb[28].mxu0 }
 0xaea   : > { %v2781_v63 = vpop.f32.mrb[29].mxu0  ;;  %v1662_v1 = vsel %vm422_vm3, %v1561_v62, -inf }
 0xaeb   : > { %1663 = vmax.xlane.f32.xlu1 %v1662_v1  ;;  %v1564_v2 = vpop.f32.mrb[30].mxu0 }
 0xaec   : > { %v2782_v9 = vpop.f32.mrb[31].mxu0 }
 0xb00   : > { %v1607_v10 = vpop.f32.mrb[24].mxu1 }
 0xb01   : > { %v2787_v3 = vpop.f32.mrb[25].mxu1  ;;  %v1665_v11 = vsel %vm422_vm3, %v1607_v10, -inf }
 0xb02   : > { %1666 = vmax.xlane.f32.xlu0 %v1665_v11  ;;  %v1610_v12 = vpop.f32.mrb[26].mxu1  ;;  %v2920_v3 = vld [vmem:[#allocation2 + $0xc] ss:$20 sps:$4 sm:$0xff]  }
 0xb03   : > { %v2788_v13 = vpop.f32.mrb[27].mxu1  ;;  %v2923_v12 = vld [vmem:[#allocation2 + $0x34] ss:$20 sps:$4 sm:$0xff]  }
 0xb05   : > { %v1661_v20 = vpop.xlane.xlu0 %1660 }
 0xb06   : > { %v1671_v21 = vsub.f32 %v1515_v57, %v1661_v20 }
 0xb08   : > { %v1653_v15 = vpop.f32.mrb[32].mxu0  ;;  %v1675_v22 = vmul.f32 1.442695, %v1671_v21 }
 0xb09   : > { %v2793_v16 = vpop.f32.mrb[33].mxu0  ;;  %v1668_v17 = vsel %vm422_vm3, %v1653_v15, -inf }
 0xb0a   : > { %1669 = vmax.xlane.f32.xlu1 %v1668_v17  ;;  %v1656_v19 = vpop.f32.mrb[34].mxu0  ;;  %2948 = vpow2.f32 %v1675_v22 }
 0xb0b   : > { %v2794_v18 = vpop.f32.mrb[35].mxu0 }
 0xb14   : > { %v2949_v24 = vpop.eup %2948 }
 0xb15   : > { %v1683_v25 = vsel %vm422_vm3, %v2949_v24, 0.0 }
 0xb18   : > { %1707 = vrot.lane.b32.xlu0 %v3367_v23, %s3072_s14 }
 0xb1b   : > { %1709 = vrot.lane.b32.xlu1 %v3387_v37, %s3072_s14 }
 0xb3f   : > { %1684 = vadd.xlane.f32.xlu1 %v1683_v25 }
 0xb50   : > { %1713 = vrot.lane.b32.xlu1 %v3392_v39, %s3072_s14 }
 0xb78   : > { %v1664_v26 = vpop.xlane.xlu1 %1663 }
 0xb79   : > { %v1672_v27 = vsub.f32 %v1561_v62, %v1664_v26 }
 0xb7b   : > { %v1677_v28 = vmul.f32 1.442695, %v1672_v27 }
 0xb7d   : > { %2950 = vpow2.f32 %v1677_v28 }
 0xb87   : > { %v2951_v29 = vpop.eup %2950 }
 0xb88   : > { %v1686_v23 = vsel %vm422_vm3, %v2951_v29, 0.0 }
 0xb89   : > { %1687 = vadd.xlane.f32.xlu0 %v1686_v23 }
 0xb8f   : > { %v1667_v30 = vpop.xlane.xlu0 %1666 }
 0xb90   : > { %v1673_v31 = vsub.f32 %v1607_v10, %v1667_v30 }
 0xb92   : > { %v1679_v32 = vmul.f32 1.442695, %v1673_v31 }
 0xb93   : > { %v1708_v47 = vpop.permute.xlu0 %1707 }
 0xb94   : > { %2952 = vpow2.f32 %v1679_v32 }
 0xb97   : > { %v1670_v36 = vpop.xlane.xlu1 %1669 }
 0xb98   : > { %v1674_v37 = vsub.f32 %v1653_v15, %v1670_v36 }
 0xb9a   : > { %v1681_v39 = vmul.f32 1.442695, %v1674_v37 }
 0xb9b   : > { %v1710_v41 = vpop.permute.xlu1 %1709 }
 0xb9c   : > { %2954 = vpow2.f32 %v1681_v39 }
 0xb9e   : > { %v2953_v33 = vpop.eup %2952 }
 0xb9f   : > { %1711 = vrot.lane.b32.xlu0 %v3390_v38, %s3072_s14  ;;  %v1689_v34 = vsel %vm422_vm3, %v2953_v33, 0.0  ;;  %s3003_s14 = scalar_lea.vmem %s3002_s13, 256 }
 0xba0   : > { %1690 = vadd.xlane.f32.xlu1 %v1689_v34 }
 0xba6   : > { %v2955_v8 = vpop.eup %2954 }
 0xba7   : > { %v1692_v40 = vsel %vm422_vm3, %v2955_v8, 0.0 }
 0xbbe   : > { %1693 = vadd.xlane.f32.xlu0 %v1692_v40 }
 0xbcc   : > { %v1685_v42 = vpop.xlane.xlu1 %1684 }
 0xbcd   : > { %1735 = vxpose.xlu1.c.b16.start.end [1/1] (short) (narrow) %v1710_v41, 16  ;;  %2956 = vrcp.f32 %v1685_v42 }
 0xbd0   : > { %v1714_v43 = vpop.permute.xlu1 %1713 }
 0xbd1   : > { %1767 = vxpose.xlu1.c.b16.start.end [1/1] (short) (narrow) %v1714_v43, 16 }
 0xbd7   : > { %v2957_v44 = vpop.eup %2956 }
 0xbd8   : > { %v1699_v45 = vmul.f32 %v2957_v44, %v2949_v24 }
 0xbda   : > { %v1703_v38 = vpack.c.bf16 %v1699_v45, %v1699_v45 }
 0xbdc   : > { %v1787_v46 = vsel %vm422_vm3, %v1703_v38, 0 }
 0xbdd   : > { %2796 = vmatpush3.bf16.xpose.msra.mxu1 %v1787_v46 }
 0xbde   : > { %2807 = vmatprep.subr.bf16.mxu1 %v3068_v0 }
 0xbeb   : > { %1719 = vxpose.xlu0.c.b16.start.end [1/1] (short) (narrow) %v1708_v47, 16 }
 0xc16   : > { %v1688_v48 = vpop.xlane.xlu0 %1687 }
 0xc17   : > { %2958 = vrcp.f32 %v1688_v48 }
 0xc1a   : > { %v1712_v49 = vpop.permute.xlu0 %1711 }
 0xc1b   : > { %1751 = vxpose.xlu0.c.b16.start.end [1/1] (short) (narrow) %v1712_v49, 16 }
 0xc21   : > { %v2959_v50 = vpop.eup %2958 }
 0xc22   : > { %v1700_v51 = vmul.f32 %v2959_v50, %v2951_v29 }
 0xc24   : > { %v1704_v52 = vpack.c.bf16 %v1700_v51, %v1700_v51 }
 0xc26   : > { %v1833_v53 = vsel %vm422_vm3, %v1704_v52, 0 }
 0xc27   : > { %2802 = vmatpush3.bf16.xpose.msra.mxu0 %v1833_v53 }
 0xc28   : > { %2813 = vmatprep.subr.bf16.mxu0 %v3068_v0 }
 0xc2d   : > { %v1691_v54 = vpop.xlane.xlu1 %1690 }
 0xc2e   : > { %2960 = vrcp.f32 %v1691_v54 }
 0xc33   : > { %v1743_v55 = vpop.trf.xlu1 }
 0xc34   : > { %2804 = vmatmul.mubr.msk.bf16.vlgmr.msra.gmra.mrb[36].mxu0 %vm422_vm3, %v1743_v55 }
 0xc35   : > { %2815 = vmatprep.mubr.msk.bf16.mxu0 %vm3069_vm0, %v3068_v0 }
 0xc37   : > { %v1775_v10 = vpop.trf.xlu1 }
 0xc38   : > { %v2961_v57 = vpop.eup %2960 }
 0xc39   : > { %v1701_v58 = vmul.f32 %v2961_v57, %v2953_v33 }
 0xc3b   : > { %v1705_v60 = vpack.c.bf16 %v1701_v58, %v1701_v58 }
 0xc3d   : > { %v1879_v62 = vsel %vm422_vm3, %v1705_v60, 0 }
 0xc4b   : > { %v1694_v59 = vpop.xlane.xlu0 %1693 }
 0xc4c   : > { %2962 = vrcp.f32 %v1694_v59 }
 0xc51   : > { %v1727_v61 = vpop.trf.xlu0 }
 0xc52   : > { %2798 = vmatmul.mubr.msk.bf16.vlgmr.msra.gmra.mrb[28].mxu1 %vm422_vm3, %v1727_v61 }
 0xc53   : > { %2808 = vmatpush3.bf16.xpose.msra.mxu1 %v1879_v62  ;;  %2809 = vmatprep.mubr.msk.bf16.mxu1 %vm3069_vm0, %v3068_v0 }
 0xc54   : > { %2819 = vmatprep.subr.bf16.mxu1 %v3068_v0 }
 0xc56   : > { %v2963_v63 = vpop.eup %2962 }
 0xc57   : > { %v1702_v1 = vmul.f32 %v2963_v63, %v2955_v8 }
 0xc59   : > { %v1706_v2 = vpack.c.bf16 %v1702_v1, %v1702_v1 }
 0xc5b   : > { %v1925_v9 = vsel %vm422_vm3, %v1706_v2, 0 }
 0xc5c   : > { %2814 = vmatpush3.bf16.xpose.msra.mxu0 %v1925_v9 }
 0xc5d   : > { %2827 = vmatprep.subr.bf16.mxu0 %v3068_v0 }
 0xc63   : > { %2816 = vmatmul.mubr.msk.bf16.vlgmr.msra.gmra.mrb[40].mxu0 %vm422_vm3, %v1775_v10 }
 0xc64   : > { %2831 = vmatprep.mubr.msk.bf16.mxu0 %vm3069_vm0, %v3068_v0 }
 0xc81   : > { %v1759_v11 = vpop.trf.xlu0 }
 0xc82   : > { %2810 = vmatmul.mubr.msk.bf16.vlgmr.msra.gmra.mrb[32].mxu1 %vm422_vm3, %v1759_v11 }
 0xc83   : > { %2820 = vmatpush3.bf16.msra.mxu1 %v2920_v3  ;;  %2823 = vmatprep.mubr.msk.bf16.mxu1 %vm3069_vm0, %v3068_v0 }
 0xc84   : > { %2821 = vmatprep.subr.bf16.mxu1 %v3068_v0 }
 0xc87   : > { %2822 = vmatpush3.bf16.msra.mxu1 %v2923_v12 }
 0xc88   : > { %2835 = vmatprep.subr.bf16.mxu1 %v3068_v0 }
 0xd07   : > { %v1869_v13 = vpop.f32.mrb[36].mxu0 }
 0xd08   : > { %v2805_v15 = vpop.f32.mrb[37].mxu0  ;;  %1999 = vxpose.xlu1.b32.start.end [1/1] (short) (narrow) %v1869_v13, 8 }
 0xd09   : > { %v1872_v16 = vpop.f32.mrb[38].mxu0 }
 0xd0a   : > { %v2806_v17 = vpop.f32.mrb[39].mxu0 }
 0xd25   : > { %v1823_v19 = vpop.f32.mrb[28].mxu1 }
 0xd26   : > { %v2799_v18 = vpop.f32.mrb[29].mxu1  ;;  %1967 = vxpose.xlu0.b32.start.end [1/1] (short) (narrow) %v1823_v19, 8 }
 0xd27   : > { %v1826_v20 = vpop.f32.mrb[30].mxu1  ;;  %v2249_v18 = vsub.s32 3, %v3219_v6 }
 0xd28   : > { %v2800_v21 = vpop.f32.mrb[31].mxu1  ;;  %v2968_v20 = vld [vmem:[%s3575_s4] sm:$0xff] }
 0xd29   : > { %v2250_v21 = vrot.slane %v2968_v20, %v2249_v18 }
 0xd36   : > { %v1961_v22 = vpop.f32.mrb[40].mxu0 }
 0xd37   : > { %v2817_v24 = vpop.f32.mrb[41].mxu0 }
 0xd38   : > { %v1964_v25 = vpop.f32.mrb[42].mxu0 }
 0xd39   : > { %v2818_v26 = vpop.f32.mrb[43].mxu0 }
 0xd55   : > { %v1915_v27 = vpop.f32.mrb[32].mxu1 }
 0xd56   : > { %2031 = vxpose.xlu0.b32.start.end [1/1] (short) (narrow) %v1915_v27, 8  ;;  %v2811_v28 = vpop.f32.mrb[33].mxu1 }
 0xd57   : > { %v1918_v29 = vpop.f32.mrb[34].mxu1 }
 0xd58   : > { %v2812_v23 = vpop.f32.mrb[35].mxu1 }
 0xd5a   : > { %2063 = vxpose.xlu0.b32.start.end [1/1] (short) (narrow) %v1961_v22, 8 }
 0xd88   : > { %v2015_v32 = vpop.trf.xlu1 }
 0xda6   : > { %v1983_v30 = vpop.trf.xlu0 }
 0xdd6   : > { %v2047_v31 = vpop.trf.xlu0 }
 0xdd7   : > { %v2095_v33 = vcombine.low %v1983_v30, %v2047_v31  ;;  %v2096_v34 = vcombine.high %v1983_v30, %v2047_v31 }
 0xdd9   : > { %v2103_v8 = vrot.slane %v2095_v33, %v3311_v5  ;;  %v2110_v40 = vrot.slane %v2096_v34, %v3311_v5  ;;  %v2924_v34 = vld [vmem:[#allocation2 + $0x10] ss:$20 sps:$4 sm:$0xff]  }
 0xdda   : > { %v2079_v36 = vpop.trf.xlu0  ;;  %2828 = vmatpush3.bf16.msra.mxu0 %v2924_v34 }
 0xddb   : > { %v2111_v37 = vcombine.low %v2015_v32, %v2079_v36  ;;  %v2112_v39 = vcombine.high %v2015_v32, %v2079_v36  ;;  %v2925_v36 = vld [vmem:[#allocation2 + $0x38] ss:$20 sps:$4 sm:$0xff]   ;;  %2829 = vmatprep.subr.bf16.mxu0 %v3068_v0 }
 0xddd   : > { %v2119_v41 = vrot.slane %v2111_v37, %v3311_v5  ;;  %v2126_v42 = vrot.slane %v2112_v39, %v3311_v5  ;;  %v2927_v37 = vld [vmem:[%s3574_s3 + $0x8] sm:$0xff]  }
 0xdde   : > { %2830 = vmatpush3.bf16.msra.mxu0 %v2925_v36 }
 0xddf   : > { %v2127_v43 = vcombine.low %v2103_v8, %v2119_v41  ;;  %v2128_v44 = vcombine.high %v2103_v8, %v2119_v41  ;;  %v2143_v45 = vcombine.low %v2110_v40, %v2126_v42  ;;  %v2144_v38 = vcombine.high %v2110_v40, %v2126_v42  ;;  %v276_v41 = vld [vmem:[%s3575_s4 + $0x8] sm:$0xf] }
 0xde0   : > { %v2319_v42 = vrot.slane %v276_v41, %v280_v7  ;;  %v2929_v7 = vld [vmem:[%s3574_s3 + $0x18] sm:$0xff]  }
 0xde1   : > { %v2135_v46 = vrot.slane %v2127_v43, %v3314_v14  ;;  %v2142_v47 = vrot.slane %v2128_v44, %v3314_v14  ;;  %v2151_v48 = vrot.slane %v2143_v45, %v3314_v14  ;;  %v2158_v49 = vrot.slane %v2144_v38, %v3314_v14 }
 0xde2   : > { %v2324_v44 = vrot.slane %v276_v41, %v1200_v56  ;;  %v2329_v56 = vsub.s32 4, %v3219_v6 }
 0xde3   : > { %v2163_v50 = vcombine.low %v2135_v46, %v2142_v47  ;;  %v2619_v51 = vcombine.high %v2135_v46, %v2142_v47  ;;  %v2179_v52 = vcombine.low %v2151_v48, %v2158_v49  ;;  %v2620_v53 = vcombine.high %v2151_v48, %v2158_v49  ;;  %v2928_v48 = vld [vmem:[%s3574_s3 + $0x10] sm:$0xff]  }
 0xde4   : > { %v2330_v49 = vrot.slane %v2968_v20, %v2329_v56 }
 0xde5   : > { %v2170_v54 = vrot.slane %v2163_v50, %v3311_v5  ;;  %v2178_v55 = vrot.slane %v2619_v51, %v3311_v5  ;;  %v2186_v57 = vrot.slane %v2179_v52, %v3311_v5  ;;  %v2194_v58 = vrot.slane %v2620_v53, %v3311_v5 }
 0xde7   : > { %v2196_v59 = vcombine.high %v2170_v54, %v2178_v55  ;;  %v2212_v60 = vcombine.high %v2186_v57, %v2194_v58  ;;  %v2195_v61 = vcombine.low %v2170_v54, %v2178_v55  ;;  %v2211_v62 = vcombine.low %v2186_v57, %v2194_v58 }
 0xde8   : > { %v2390_v58 = vsub.s32 5, %v3219_v6 }
 0xde9   : > { %v2210_v63 = vrot.slane %v2196_v59, %v3314_v14  ;;  %v2226_v1 = vrot.slane %v2212_v60, %v3314_v14  ;;  %v2203_v2 = vrot.slane %v2195_v61, %v3314_v14  ;;  %v2219_v9 = vrot.slane %v2211_v62, %v3314_v14 }
 0xdeb   : > { %v2229_v10 = vcombine.low %v2210_v63, %v2226_v1  ;;  %v2228_v3 = vcombine.high %v2203_v2, %v2219_v9  ;;  %v2227_v11 = vcombine.low %v2203_v2, %v2219_v9  ;;  %v2230_v5 = vcombine.high %v2210_v63, %v2226_v1 }
 0xded   : > { %2236 = vrot.lane.b32.xlu0 %v2229_v10, %s3077_s17  ;;  %2232 = vrot.lane.b32.xlu1 %v2228_v3, %s3078_s23 }
 0xdf1   : > { %2240 = vrot.lane.b32.xlu1 %v2230_v5, %s3079_s25  ;;  %s241_s25 = sand.u32 1, %s3055_s19  }
 0xdf2   : > { %s2588_s26 = sshll.u32 %s241_s25, 3  ;;  %s2486_s11 = scalar_lea.sflag [#allocation4], %s241_s25 }
 0xdf3   : > { %s243_s8 = scalar_lea.vmem [#allocation5], %s2588_s26 }
 0xdf4   : > { %s2499_s6 = sshll.u32 %s243_s8, 4  ;;  %s3530_s6 = int_to_ptr.vmem [resolvable:$true] %s2499_s6 }
 0xdf5   : > { %s2997_s12 = scalar_lea.vmem %s3530_s6, 128  ;;  %p3004_p2 = scmp.lt.s32.totalorder %s3530_s6, %s3002_s13 }
 0xdf6   : > { %p2998_p6 = scmp.ne.s32.totalorder %s3530_s6, %s2997_s12  ;;  %p3005_p3 = scmp.lt.s32.totalorder %s3003_s14, %s2997_s12 }
 0xdf8   : > { %p2999_p10 = pnand %p2998_p6, %p3587_p9  ;;  %p3006_p4 = por %p3005_p3, %p3004_p2 }
 0xdfa   : > { %p3000_p12 = pneg %p2999_p10 }
 0xdfc   : > { %p3007_p7 = pnand %p3006_p4, %p3000_p12 }
 0xe5f   : > { %v2233_v12 = vpop.permute.xlu1 %2232  ;;  %v2237_v13 = vpop.permute.xlu0 %2236 }
 0xe60   : > { %v2243_v15 = vsel %vm422_vm3, %v2227_v11, %v2233_v12 }
 0xe61   : > { %v2244_v17 = vsel %vm1193_vm4, %v2243_v15, %v2237_v13 }
 0xe63   : > { %v2241_v16 = vpop.permute.xlu1 %2240 }
 0xe64   : > { %v2245_v19 = vsel %vm1195_vm5, %v2244_v17, %v2241_v16  ;;  %v2477_v16 = vrot.slane %v276_v41, %v1281_v4 }
 0xe65   : > { %v2246_v14 = vpack.c.bf16 %v2245_v19, %v2245_v19  ;;  %v2482_v19 = vrot.slane %v276_v41, %v2249_v18 }
 0xe67   : > { %2824 = vmatmul.mubr.msk.bf16.vlgmr.msra.gmra.mrb[36].mxu1 %vm294_vm1, %v2246_v14 }
 0xe68   : > { %2843 = vmatprep.mubr.msk.bf16.mxu1 %vm3069_vm0, %v3068_v0 }
 0xf3a   : > { %v2296_v22 = vpop.f32.mrb[36].mxu1 }
 0xf3b   : > { %v2297_v24 = vadd.f32 %v2296_v22, %v2250_v21  ;;  %v2825_v25 = vpop.f32.mrb[37].mxu1 }
 0xf3c   : > { %v2299_v26 = vpop.f32.mrb[38].mxu1 }
 0xf3d   : > { %v2826_v27 = vpop.f32.mrb[39].mxu1  ;;  %v2302_v28 = vadd.f32 %v2297_v24, %v3380_v35  ;;  %v2926_v35 = vld [vmem:[%s3574_s3] sm:$0xff]  }
 0xf3e   : > { %2836 = vmatpush3.bf16.msra.mxu1 %v2926_v35 }
 0xf3f   : > { %v2303_v29 = vsel %vm294_vm1, %v2302_v28, 0.0  ;;  %2837 = vmatprep.subr.bf16.mxu1 %v3068_v0 }
 0xf40   : > { %2304 = vadd.xlane.f32.xlu1 %v2303_v29 }
 0xf42   : > { %2838 = vmatpush3.bf16.msra.mxu1 %v2927_v37 }
 0xf43   : > { %2839 = vmatprep.subr.bf16.mxu1 %v3068_v0 }
 0xf46   : > { %2840 = vmatpush3.bf16.msra.mxu1 %v2928_v48 }
 0xf47   : > { %2841 = vmatprep.subr.bf16.mxu1 %v3068_v0  ;;  %v2391_v0 = vrot.slane %v2968_v20, %v2390_v58 }
 0xf4a   : > { %2842 = vmatpush3.bf16.msra.mxu1 %v2929_v7 }
 0xfcd   : > { %v2305_v23 = vpop.xlane.xlu1 %2304 }
 0xfce   : > { %v2306_v30 = vmul.f32 0.03125, %v2305_v23 }
 0xfd0   : > { %v2307_v31 = vsub.f32 %v2302_v28, %v2306_v30 }
 0xfd2   : > { %v2308_v32 = vmul.f32 %v2307_v31, %v2307_v31 }
 0xfd4   : > { %v2309_v33 = vsel %vm294_vm1, %v2308_v32, 0.0 }
 0xfd5   : > { %2310 = vadd.xlane.f32.xlu0 %v2309_v33 }
0x1062   : > { %v2311_v39 = vpop.xlane.xlu0 %2310 }
0x1063   : > { %v2312_v8 = vmul.f32 0.03125, %v2311_v39 }
0x1065   : > { %v2313_v40 = vadd.f32 1e-05, %v2312_v8 }
0x1067   : > { %2964 = vrsqrt.f32 %v2313_v40 }
0x1071   : > { %v2965_v43 = vpop.eup %2964 }
0x1072   : > { %v2315_v45 = vmul.f32 %v2965_v43, %v2307_v31 }
0x1074   : > { %v2320_v38 = vmul.f32 %v2319_v42, %v2315_v45 }
0x1076   : > { %v2325_v46 = vadd.f32 %v2324_v44, %v2320_v38 }
0x1078   : > { %v2326_v47 = vpack.c.bf16 %v2325_v46, %v2325_v46 }
0x107a   : > { %2832 = vmatmul.mubr.msk.bf16.vlgmr.msra.gmra.mrb[44].mxu0 %vm294_vm1, %v2326_v47 }
0x114d   : > { %v2380_v50 = vpop.f32.mrb[44].mxu0 }
0x114e   : > { %v2381_v51 = vadd.f32 %v2380_v50, %v2330_v49  ;;  %v2833_v52 = vpop.f32.mrb[45].mxu0 }
0x114f   : > { %v2383_v53 = vpop.f32.mrb[46].mxu0 }
0x1150   : > { %v2386_v54 = vmax.f32 %v2381_v51, 0.0  ;;  %v2834_v55 = vpop.f32.mrb[47].mxu0 }
0x1152   : > { %v2387_v57 = vpack.c.bf16 %v2386_v54, %v2386_v54 }
0x1154   : > { %2844 = vmatmul.mubr.msk.bf16.vlgmr.msra.gmra.mrb[40].mxu1 %vm2416_vm6, %v2387_v57 }
0x1227   : > { %v2454_v59 = vpop.f32.mrb[40].mxu1 }
0x1228   : > { %v2455_v60 = vadd.f32 %v2454_v59, %v2391_v0  ;;  %v2845_v61 = vpop.f32.mrb[41].mxu1 }
0x1229   : > { %v2457_v62 = vpop.f32.mrb[42].mxu1 }
0x122a   : > { %v2846_v63 = vpop.f32.mrb[43].mxu1  ;;  %v2460_v1 = vadd.f32 %v2455_v60, %v2325_v46 }
0x122c   : > { %v2461_v2 = vsel %vm294_vm1, %v2460_v1, 0.0 }
0x122d   : > { %2462 = vadd.xlane.f32.xlu1 %v2461_v2 }
0x12ba   : > { %v2463_v9 = vpop.xlane.xlu1 %2462 }
0x12bb   : > { %v2464_v10 = vmul.f32 0.03125, %v2463_v9 }
0x12bd   : > { %v2465_v3 = vsub.f32 %v2460_v1, %v2464_v10 }
0x12bf   : > { %v2466_v11 = vmul.f32 %v2465_v3, %v2465_v3 }
0x12c1   : > { %v2467_v5 = vsel %vm294_vm1, %v2466_v11, 0.0 }
0x12c2   : > { %2468 = vadd.xlane.f32.xlu0 %v2467_v5 }
0x134f   : > { %v2469_v12 = vpop.xlane.xlu0 %2468 }
0x1350   : > { %v2470_v13 = vmul.f32 0.03125, %v2469_v12 }
0x1352   : > { %v2471_v15 = vadd.f32 1e-05, %v2470_v13 }
0x1354   : > { %2966 = vrsqrt.f32 %v2471_v15 }
0x135e   : > { %v2967_v17 = vpop.eup %2966 }
0x135f   : > { %v2473_v14 = vmul.f32 %v2967_v17, %v2465_v3 }
0x1361   : > { %v2478_v20 = vmul.f32 %v2477_v16, %v2473_v14 }
0x1363   : > { %v2483_v21 = vadd.f32 %v2482_v19, %v2478_v20 }
0x1365   : > { %2484 = vst.msk [vmem:[%s243_s8] sm:$0xff] %vm294_vm1, %v2483_v21 }
0x1366   : > { %3010 = shalt.err (!%p3007_p7)
}
0x1367   : > { %s3011_s15 = scalar_lea.hbm %s3528_s10, 128  ;;  %s3015_s23 = scalar_lea.hbm %s3576_s5, 256 }
0x1368   : > { %p3012_p8 = scmp.ne.s32.totalorder %s3528_s10, %s3011_s15  ;;  %p3016_p1 = scmp.lt.u32.totalorder %s3528_s10, %s3576_s5 }
0x1369   : > { %p3017_p0 = scmp.lt.u32.totalorder %s3015_s23, %s3011_s15  ;;  %p3019_p6 = scmp.lt.u32.totalorder %s3011_s15, %s3528_s10 }
0x136a   : > { %p3013_p11 = pnand %p3012_p8, %p3587_p9 }
0x136b   : > { %p3018_p5 = por %p3017_p0, %p3016_p1 }
0x136c   : > { %p3014_p13 = pneg %p3013_p11 }
0x136d   : > { %p3020_p10 = por %p3019_p6, %p3018_p5 }
0x136f   : > { %p3021_p12 = pnand %p3020_p10, %p3014_p13 }
0x1371   : > { %3024 = shalt.err (!%p3021_p12)
}
0x1372   : > { %2851 = dma.vmem_to_hbm [thread:$0]  (%p3587_p9), %s3530_s6, 128, %s3528_s10, %s2486_s11  }
0x1373 PF: > { %p2863_p2 = scmp.ge.s32.totalorder %s3063_s21, 2  ;;  %s2511_s7 = sand.u32 1, %s3051_s18  }
0x1374   : > { %p3588_p3 = scmp.ne.s32.totalorder %s3581_s29, 0  ;;  %s2512_s8 = scalar_lea.sflag [#allocation4], %s2511_s7 }
0x1376   : > { %p2858_p4 = pnand %p2863_p2, %p3588_p3 }
0x1378   : > { %3046 = dma.done.wait (!%p2858_p4), %s2512_s8, 128  }
0x1379   : > { %3048 = vsyncadd (!%p2858_p4), %s2512_s8, 4294967168  ;;  %p16_p7 = scmp.ge.s32.totalorder %s3136_s24, 4   ;;  %s3589_s18 = smov %s3055_s19 }
0x137a   : > { %s3590_s19 = smov %s3059_s20  ;;  %s3591_s20 = smov %s3147_s27 }
0x137b   : > { %s3592_s21 = smov %s3136_s24  ;;  %18 = sbr.rel (!%p16_p7) target bundleno = 4 (0x4), region = 83 }
0x1382   :  { %2517 = vsyncpa [#allocation3], 1 }
0x1383   :  { %2519 = vsyncpa [#allocation3 + $0x1], 1 }
0x1384   :  { %2520 = vsyncpa [#allocation4], 1 }
0x1385   :  { %2522 = vsyncpa [#allocation4 + $0x1], 1 }

</bundles_post_ra>
